<compile_context>
chip_gen: v5e
topology: v5e:2x2
jax: 0.10.0
libtpu: 0.0.40
codegen_flags: <defaults>
</compile_context>

<pallas_src>
import functools

import jax
import jax.numpy as jnp
from jax import lax
from jax.experimental import pallas as pl
from jax.experimental.pallas import tpu as pltpu

HIDDEN = 1024  # fixed by the module definition (nn.Linear(small_emb_dim, 1024))

_INV_SQRT2 = 0.7071067811865476


def _round_up(x, m):
    return ((x + m - 1) // m) * m


def _mlp_kernel(x_ref, w1_ref, b1_ref, w2_ref, b2_ref, o_ref):
    # x_ref:  (tm, D1)  bf16   w1_ref: (D1, H)  bf16   b1_ref: (1, H)  f32
    # w2_ref: (H, tn)   bf16   b2_ref: (1, tn)  f32    o_ref:  (tm, tn)
    # First projection on the MXU, f32 accumulation.
    h = jnp.dot(x_ref[...], w1_ref[...], preferred_element_type=jnp.float32)
    h = h + b1_ref[...]
    # Exact GELU (nn.GELU() default): 0.5 * x * (1 + erf(x / sqrt(2))), in f32.
    h = 0.5 * h * (1.0 + lax.erf(h * jnp.float32(_INV_SQRT2)))
    # Second projection in bf16 on the MXU, f32 accumulation.
    h = h.astype(w2_ref.dtype)
    out = jnp.dot(h, w2_ref[...], preferred_element_type=jnp.float32)
    out = out + b2_ref[...]
    o_ref[...] = out.astype(o_ref.dtype)


@functools.partial(jax.jit, static_argnames=("tm", "tn"))
def linear_projection(x, w1, b1, w2, b2, *, tm=256, tn=None):
    """x: [B, S, D1] -> [B, S, D2] via Linear(D1,1024) -> GELU -> Linear(1024,D2)."""
    B, S, D1 = x.shape
    H = w1.shape[1]
    D2 = w2.shape[1]
    M = B * S

    # Clamp the row tile for small problems: one grid step, whole problem in VMEM.
    tm_eff = min(tm, _round_up(M, 8))

    # Tile the output feature dim only when it is large enough to threaten the
    # VMEM budget (W2 tile = H * tn * 2 bytes, double-buffered).
    if tn is None:
        if D2 > 2048 and D2 % 512 == 0:
            tn_eff = 512
        else:
            tn_eff = D2
    else:
        tn_eff = tn

    grid = (pl.cdiv(M, tm_eff), pl.cdiv(D2, tn_eff))

    # bf16 operands for the MXU; biases (and all elementwise math) stay f32.
    x2 = x.reshape(M, D1).astype(jnp.bfloat16)
    w1b = w1.astype(jnp.bfloat16)
    w2b = w2.astype(jnp.bfloat16)
    b1_2d = b1.reshape(1, H).astype(jnp.float32)
    b2_2d = b2.reshape(1, D2).astype(jnp.float32)

    out = pl.pallas_call(
        _mlp_kernel,
        out_shape=jax.ShapeDtypeStruct((M, D2), x.dtype),
        grid_spec=pltpu.PrefetchScalarGridSpec(
            num_scalar_prefetch=0,
            grid=grid,
            in_specs=[
                pl.BlockSpec((tm_eff, D1), lambda i, j: (i, 0)),   # x row tile
                pl.BlockSpec((D1, H), lambda i, j: (0, 0)),        # W1 (full)
                pl.BlockSpec((1, H), lambda i, j: (0, 0)),         # b1
                pl.BlockSpec((H, tn_eff), lambda i, j: (0, j)),    # W2 column tile
                pl.BlockSpec((1, tn_eff), lambda i, j: (0, j)),    # b2 column tile
            ],
            out_specs=pl.BlockSpec((tm_eff, tn_eff), lambda i, j: (i, j)),
        ),
        compiler_params=pltpu.CompilerParams(
            dimension_semantics=("parallel", "parallel"),
            vmem_limit_bytes=64 * 1024 * 1024,
        ),
    )(x2, w1b, b1_2d, w2b, b2_2d)

    return out.reshape(B, S, D2)


def init_params(key, small_emb_dim, big_model_dim):
    """Deterministic init mimicking PyTorch nn.Linear default (U(-1/sqrt(fan_in), 1/sqrt(fan_in)))."""
    k1, k2, k3, k4 = jax.random.split(key, 4)
    bound1 = 1.0 / jnp.sqrt(small_emb_dim)
    bound2 = 1.0 / jnp.sqrt(HIDDEN)
    w1 = jax.random.uniform(k1, (small_emb_dim, HIDDEN), jnp.float32, -bound1, bound1)
    b1 = jax.random.uniform(k2, (HIDDEN,), jnp.float32, -bound1, bound1)
    w2 = jax.random.uniform(k3, (HIDDEN, big_model_dim), jnp.float32, -bound2, bound2)
    b2 = jax.random.uniform(k4, (big_model_dim,), jnp.float32, -bound2, bound2)
    return w1, b1, w2, b2


if __name__ == "__main__":
    small_emb_dim = 32
    big_model_dim = 64
    B, S = 2, 8

    key = jax.random.PRNGKey(0)
    kx, kp = jax.random.split(key)
    x = jax.random.normal(kx, (B, S, small_emb_dim), jnp.float32)
    w1, b1, w2, b2 = init_params(kp, small_emb_dim, big_model_dim)

    out = linear_projection(x, w1, b1, w2, b2)
    out = jax.block_until_ready(out)
    assert out.shape == (B, S, big_model_dim)

    # Matched-precision reference (bf16 MXU operands, f32 accumulation) - tight check.
    xb = x.reshape(-1, small_emb_dim).astype(jnp.bfloat16)
    h_ref = jnp.dot(xb, w1.astype(jnp.bfloat16), preferred_element_type=jnp.float32) + b1
    h_ref = jax.nn.gelu(h_ref, approximate=False).astype(jnp.bfloat16)
    ref_match = (
        jnp.dot(h_ref, w2.astype(jnp.bfloat16), preferred_element_type=jnp.float32) + b2
    ).reshape(B, S, big_model_dim)
    assert jnp.allclose(out, ref_match, atol=5e-3, rtol=5e-3)

    # Full-f32 reference - loose check (bf16 matmul operands introduce ~1e-3 error).
    ref_f32 = jax.nn.gelu(x @ w1 + b1, approximate=False) @ w2 + b2
    assert jnp.allclose(out, ref_f32, atol=3e-2, rtol=3e-2)

    print("KERNEL_OK")
</pallas_src>

<mosaic_0001>
module attributes {stable_mosaic.version = 11 : i64} {
  func.func @_mlp_kernel(%arg0: i32, %arg1: i32, %arg2: memref<16x32xbf16, #tpu.memory_space<vmem>>, %arg3: memref<32x1024xbf16, #tpu.memory_space<vmem>>, %arg4: memref<1x1024xf32, #tpu.memory_space<vmem>>, %arg5: memref<1024x64xbf16, #tpu.memory_space<vmem>>, %arg6: memref<1x64xf32, #tpu.memory_space<vmem>>, %arg7: memref<16x64xf32, #tpu.memory_space<vmem>>) attributes {dimension_semantics = [#tpu.dimension_semantics<parallel>, #tpu.dimension_semantics<parallel>], iteration_bounds = array<i64: 1, 1>, scalar_prefetch = 0 : i64, scratch_operands = 0 : i64, tpu.core_type = #tpu.core_type<tc>, window_params = [{transform_indices = @transform_0, window_bounds = array<i64: 16, 32>}, {pipeline_mode = #tpu.pipeline_mode<synchronous>, transform_indices = @transform_1, window_bounds = array<i64: 32, 1024>}, {pipeline_mode = #tpu.pipeline_mode<synchronous>, transform_indices = @transform_2, window_bounds = array<i64: 1, 1024>}, {transform_indices = @transform_3, window_bounds = array<i64: 1024, 64>}, {transform_indices = @transform_4, window_bounds = array<i64: 1, 64>}, {transform_indices = @transform_5, window_bounds = array<i64: 16, 64>}]} {
    %c0 = arith.constant 0 : index
    %c0_0 = arith.constant 0 : index
    %0 = vector.load %arg2[%c0, %c0_0] : memref<16x32xbf16, #tpu.memory_space<vmem>>, vector<16x32xbf16>
    %c0_1 = arith.constant 0 : index
    %c0_2 = arith.constant 0 : index
    %1 = vector.load %arg3[%c0_1, %c0_2] : memref<32x1024xbf16, #tpu.memory_space<vmem>>, vector<32x1024xbf16>
    %cst = arith.constant dense<0.000000e+00> : vector<16x1024xf32>
    %2 = tpu.matmul %0, %1, %cst {dimension_numbers = #tpu.dot_dimension_numbers<[1], [0], [0], [1], [0, 0, 1, 1], [], []>} : vector<16x32xbf16>, vector<32x1024xbf16>, vector<16x1024xf32> -> vector<16x1024xf32>
    %c0_3 = arith.constant 0 : index
    %c0_4 = arith.constant 0 : index
    %3 = vector.load %arg4[%c0_3, %c0_4] : memref<1x1024xf32, #tpu.memory_space<vmem>>, vector<1x1024xf32>
    %4 = vector.broadcast %3 : vector<1x1024xf32> to vector<16x1024xf32>
    %5 = arith.addf %2, %4 : vector<16x1024xf32>
    %cst_5 = arith.constant 5.000000e-01 : f32
    %6 = vector.broadcast %cst_5 : f32 to vector<16x1024xf32>
    %7 = arith.mulf %6, %5 : vector<16x1024xf32>
    %cst_6 = arith.constant 0.707106769 : f32
    %8 = vector.broadcast %cst_6 : f32 to vector<16x1024xf32>
    %9 = arith.mulf %5, %8 : vector<16x1024xf32>
    %10 = math.erf %9 : vector<16x1024xf32>
    %cst_7 = arith.constant 1.000000e+00 : f32
    %11 = vector.broadcast %cst_7 : f32 to vector<16x1024xf32>
    %12 = arith.addf %11, %10 : vector<16x1024xf32>
    %13 = arith.mulf %7, %12 : vector<16x1024xf32>
    %14 = arith.truncf %13 : vector<16x1024xf32> to vector<16x1024xbf16>
    %c0_8 = arith.constant 0 : index
    %c0_9 = arith.constant 0 : index
    %15 = vector.load %arg5[%c0_8, %c0_9] : memref<1024x64xbf16, #tpu.memory_space<vmem>>, vector<1024x64xbf16>
    %cst_10 = arith.constant dense<0.000000e+00> : vector<16x64xf32>
    %16 = tpu.matmul %14, %15, %cst_10 {dimension_numbers = #tpu.dot_dimension_numbers<[1], [0], [0], [1], [0, 0, 1, 1], [], []>} : vector<16x1024xbf16>, vector<1024x64xbf16>, vector<16x64xf32> -> vector<16x64xf32>
    %c0_11 = arith.constant 0 : index
    %c0_12 = arith.constant 0 : index
    %17 = vector.load %arg6[%c0_11, %c0_12] : memref<1x64xf32, #tpu.memory_space<vmem>>, vector<1x64xf32>
    %18 = vector.broadcast %17 : vector<1x64xf32> to vector<16x64xf32>
    %19 = arith.addf %16, %18 : vector<16x64xf32>
    %c0_13 = arith.constant 0 : index
    %c0_14 = arith.constant 0 : index
    %20 = vector.load %arg7[%c0_13, %c0_14] : memref<16x64xf32, #tpu.memory_space<vmem>>, vector<16x64xf32>
    tpu.vector_store %arg7[%c0_13, %c0_14], %19 {strides = array<i32>} : memref<16x64xf32, #tpu.memory_space<vmem>>, vector<16x64xf32>,
    return
  }
  func.func @transform_0(%arg0: i32, %arg1: i32) -> (i32, i32) {
    %c0_i32 = arith.constant 0 : i32
    %c0_i32_0 = arith.constant 0 : i32
    return %arg0, %c0_i32 : i32, i32
  }
  func.func @transform_1(%arg0: i32, %arg1: i32) -> (i32, i32) {
    %c0_i32 = arith.constant 0 : i32
    %c0_i32_0 = arith.constant 0 : i32
    %c0_i32_1 = arith.constant 0 : i32
    return %c0_i32, %c0_i32_0 : i32, i32
  }
  func.func @transform_2(%arg0: i32, %arg1: i32) -> (i32, i32) {
    %c0_i32 = arith.constant 0 : i32
    %c0_i32_0 = arith.constant 0 : i32
    %c0_i32_1 = arith.constant 0 : i32
    return %c0_i32, %c0_i32_0 : i32, i32
  }
  func.func @transform_3(%arg0: i32, %arg1: i32) -> (i32, i32) {
    %c0_i32 = arith.constant 0 : i32
    %c0_i32_0 = arith.constant 0 : i32
    return %c0_i32, %arg1 : i32, i32
  }
  func.func @transform_4(%arg0: i32, %arg1: i32) -> (i32, i32) {
    %c0_i32 = arith.constant 0 : i32
    %c0_i32_0 = arith.constant 0 : i32
    return %c0_i32, %arg1 : i32, i32
  }
  func.func @transform_5(%arg0: i32, %arg1: i32) -> (i32, i32) {
    %c0_i32 = arith.constant 0 : i32
    return %arg0, %arg1 : i32, i32
  }
}

</mosaic_0001>

<bundles_post_ra>
// kernel: linear_projection.1
= control target key start
LH: loop header
LB: loop body
LE: loop exit
PB: predicated region body
PF: predicated region fallthrough
CT: control target
= control target key end

     0   :  { %vm143_vm0 = vcmask 261120   ;;  %s3307_s0 = inlined_call_operand.vmem [shape: bf16[16,32], index: 0, kind: input, shape index: {}]   ;;  %s3308_s1 = inlined_call_operand.vmem [shape: bf16[32,1024], index: 1, kind: input, shape index: {}]   ;;  %s3309_s2 = inlined_call_operand.vmem [shape: f32[1,1024], index: 2, kind: input, shape index: {}]   ;;  %s3310_s3 = inlined_call_operand.vmem [shape: bf16[1024,64], index: 3, kind: input, shape index: {}]   ;;  %s3311_s4 = inlined_call_operand.vmem [shape: f32[1,64], index: 4, kind: input, shape index: {}]   ;;  %s3312_s5 = inlined_call_operand.hbm [shape: f32[16,64], index: 5, kind: output, shape index: {}]  }
   0x1   :  { %v1658_v0 = vld [vmem:[%s3308_s1 + $0x40] sm:$0xf]  ;;  %v1977_v2 = vld [vmem:[%s3308_s1 + $0x44] sm:$0xf]  ;;  %v1666_v5 = vld [vmem:[%s3308_s1 + $0x48] sm:$0xf] }
   0x2   :  { %v1981_v1 = vld [vmem:[%s3308_s1 + $0x5c] sm:$0xf0]  ;;  %v1660_v4 = vld [vmem:[%s3308_s1 + $0x60] sm:$0xf0]  ;;  %v1982_v6 = vld [vmem:[%s3308_s1 + $0x64] sm:$0xf0] }
   0x3   :  { %v1659_v3 = vor.u32 %v1981_v1, %v1658_v0  ;;  %v1663_v7 = vor.u32 %v1977_v2, %v1660_v4  ;;  %v1667_v8 = vor.u32 %v1982_v6, %v1666_v5  ;;  %v1978_v9 = vld [vmem:[%s3308_s1 + $0x4c] sm:$0xf]  ;;  %v1626_v11 = vld [vmem:[%s3308_s1] sm:$0xf]  ;;  %v1969_v14 = vld [vmem:[%s3308_s1 + $0x4] sm:$0xf] }
   0x4   :  { %v1668_v10 = vld [vmem:[%s3308_s1 + $0x68] sm:$0xf0]  ;;  %v1973_v13 = vld [vmem:[%s3308_s1 + $0x1c] sm:$0xf0]  ;;  %v1628_v15 = vld [vmem:[%s3308_s1 + $0x20] sm:$0xf0] }
   0x5   :  { %153 = vmatpush.bf16.msra.mxu0 %v1659_v3  ;;  %v1671_v12 = vor.u32 %v1978_v9, %v1668_v10  ;;  %167 = vmatpush.bf16.msra.mxu1 %v1663_v7  ;;  %v1627_v16 = vor.u32 %v1973_v13, %v1626_v11  ;;  %v1631_v17 = vor.u32 %v1969_v14, %v1628_v15  ;;  %v1634_v18 = vld [vmem:[%s3308_s1 + $0x8] sm:$0xf]  ;;  %v1970_v20 = vld [vmem:[%s3308_s1 + $0xc] sm:$0xf]  ;;  %v1968_v23 = vld [vmem:[%s3307_s0] sm:$0xff] }
   0x6   :  { %181 = vmatpush.bf16.msra.mxu2 %v1667_v8  ;;  %v1974_v19 = vld [vmem:[%s3308_s1 + $0x24] sm:$0xf0]  ;;  %v1636_v22 = vld [vmem:[%s3308_s1 + $0x28] sm:$0xf0]  ;;  %v1682_v24 = vld [vmem:[%s3308_s1 + $0x58] sm:$0xf] }
   0x7   :  { %195 = vmatpush.bf16.msra.mxu3 %v1671_v12  ;;  %v1635_v21 = vor.u32 %v1974_v19, %v1634_v18  ;;  %v1639_v25 = vor.u32 %v1970_v20, %v1636_v22  ;;  %v1984_v26 = vld [vmem:[%s3308_s1 + $0x74] sm:$0xf0]  ;;  %v1980_v27 = vld [vmem:[%s3308_s1 + $0x5c] sm:$0xf]  ;;  %v1674_v31 = vld [vmem:[%s3308_s1 + $0x50] sm:$0xf] }
   0x8   :  { %v1684_v28 = vld [vmem:[%s3308_s1 + $0x78] sm:$0xf0]  ;;  %v1683_v29 = vor.u32 %v1984_v26, %v1682_v24  ;;  %v1983_v32 = vld [vmem:[%s3308_s1 + $0x6c] sm:$0xf0]  ;;  %v1650_v33 = vld [vmem:[%s3308_s1 + $0x18] sm:$0xf] }
   0x9   :  { %154 = vmatpush.bf16.msra.mxu0 %v1627_v16  ;;  %v1687_v30 = vor.u32 %v1980_v27, %v1684_v28  ;;  %168 = vmatpush.bf16.msra.mxu1 %v1631_v17  ;;  %v1675_v34 = vor.u32 %v1983_v32, %v1674_v31  ;;  %v1976_v35 = vld [vmem:[%s3308_s1 + $0x34] sm:$0xf0]  ;;  %v1979_v36 = vld [vmem:[%s3308_s1 + $0x54] sm:$0xf]  ;;  %v1972_v40 = vld [vmem:[%s3308_s1 + $0x1c] sm:$0xf] }
   0xa   :  { %182 = vmatpush.bf16.msra.mxu2 %v1635_v21  ;;  %v1676_v37 = vld [vmem:[%s3308_s1 + $0x70] sm:$0xf0]  ;;  %v1651_v38 = vor.u32 %v1976_v35, %v1650_v33  ;;  %v1652_v41 = vld [vmem:[%s3308_s1 + $0x38] sm:$0xf0]  ;;  %v1642_v42 = vld [vmem:[%s3308_s1 + $0x10] sm:$0xf] }
   0xb   :  { %196 = vmatpush.bf16.msra.mxu3 %v1639_v25  ;;  %v1679_v39 = vor.u32 %v1979_v36, %v1676_v37  ;;  %v1655_v43 = vor.u32 %v1972_v40, %v1652_v41  ;;  %v1975_v44 = vld [vmem:[%s3308_s1 + $0x2c] sm:$0xf0]  ;;  %v1971_v45 = vld [vmem:[%s3308_s1 + $0x14] sm:$0xf] }
   0xc   :  { %1688 = vmatmul.msk.bf16.vlgmr.msra.gmra.mxu0 %vm143_vm0, %v1968_v23  ;;  %v1644_v46 = vld [vmem:[%s3308_s1 + $0x30] sm:$0xf0]  ;;  %1689 = vmatmul.msk.bf16.vlgmr.msra.gmra.mxu1 %vm143_vm0, %v1968_v23 }
   0xd   :  { %1690 = vmatmul.msk.bf16.vlgmr.msra.gmra.mxu2 %vm143_vm0, %v1968_v23 }
   0xe   :  { %237 = vmatpush.bf16.msrb.mxu2 %v1683_v29 }
   0xf   :  { %251 = vmatpush.bf16.msrb.mxu3 %v1687_v30 }
  0x10   :  { %10 = vsyncpa [#allocation3], 0  ;;  %1691 = vmatmul.msk.bf16.vlgmr.msra.gmra.mxu3 %vm143_vm0, %v1968_v23  ;;  %209 = vmatpush.bf16.msrb.mxu0 %v1675_v34  ;;  %v1643_v47 = vor.u32 %v1975_v44, %v1642_v42  ;;  %v1647_v48 = vor.u32 %v1971_v45, %v1644_v46  ;;  %v2254_v49 = vld [vmem:[%s3309_s2] sm:$0xff]  ;;  %s1608_s27 = sshll.u32 %s3312_s5, 4  ;;  %s2112_s28 = smov 128   ;;  %s1609_s27 = int_to_ptr.hbm [resolvable:$true] %s1608_s27 }
  0x11   :  { %223 = vmatpush.bf16.msrb.mxu1 %v1679_v39  ;;  %v42_v50 = vperm.slane %v2254_v49, 0  ;;  %v43_v51 = vperm.slane %v2254_v49, 1  ;;  %v44_v58 = vperm.slane %v2254_v49, 2  ;;  %v45_v60 = vperm.slane %v2254_v49, 3  ;;  %s2113_s29 = smov 8  }
  0x12   :  { %238 = vmatpush.bf16.msrb.mxu2 %v1651_v38 }
  0x13   :  { %252 = vmatpush.bf16.msrb.mxu3 %v1655_v43 }
  0x14   :  { %210 = vmatpush.bf16.msrb.mxu0 %v1643_v47 }
  0x15   :  { %224 = vmatpush.bf16.msrb.mxu1 %v1647_v48 }
  0x1c   :  { %1692 = vmatmul.msk.bf16.vlgmr.msrb.gmra.mxu0 %vm143_vm0, %v1968_v23  ;;  %1693 = vmatmul.msk.bf16.vlgmr.msrb.gmra.mxu1 %vm143_vm0, %v1968_v23 }
  0x1d   :  { %1694 = vmatmul.msk.bf16.vlgmr.msrb.gmra.mxu2 %vm143_vm0, %v1968_v23 }
  0x20   :  { %1695 = vmatmul.msk.bf16.vlgmr.msrb.gmra.mxu3 %vm143_vm0, %v1968_v23 }
  0x89   :  { %v156_v52 = vpop.f32.mrf.mxu0  ;;  %v170_v54 = vpop.f32.mrf.mxu1 }
  0x8a   :  { %v2258_v53 = vadd.f32 %v156_v52, %v42_v50  ;;  %v2262_v55 = vadd.f32 %v170_v54, %v43_v51 }
  0x8c   :  { %v2265_v56 = vmul.f32 0.70710677, %v2258_v53  ;;  %v2268_v57 = vmul.f32 0.70710677, %v2262_v55 }
  0x8e   :  { %v291_v59 = vmul.f32 %v2265_v56, %v2265_v56  ;;  %v331_v61 = vmul.f32 %v2268_v57, %v2268_v57 }
  0x90   :  { %v2276_v62 = vmin.f32 %v291_v59, 16.0  ;;  %v184_v63 = vpop.f32.mrf.mxu2  ;;  %v2278_v0 = vmin.f32 %v331_v61, 16.0 }
  0x91   :  { %v2282_v1 = vadd.f32 %v184_v63, %v44_v58  ;;  %v158_v20 = vpop.f32.mrf.mxu0 }
  0x92   :  { %v304_v3 = vmul.f32 3.8918573e-05, %v2276_v62  ;;  %v344_v5 = vmul.f32 3.8918573e-05, %v2278_v0  ;;  %v293_v6 = vmul.f32 2.1237322e-06, %v2276_v62  ;;  %v2312_v28 = vadd.f32 %v158_v20, %v42_v50 }
  0x93   :  { %v198_v2 = vpop.f32.mrf.mxu3  ;;  %v2292_v8 = vmul.f32 0.70710677, %v2282_v1  ;;  %v333_v11 = vmul.f32 2.1237322e-06, %v2278_v0 }
  0x94   :  { %v2287_v4 = vadd.f32 %v198_v2, %v45_v60  ;;  %v305_v7 = vadd.f32 0.001143296, %v304_v3  ;;  %v345_v9 = vadd.f32 0.001143296, %v344_v5  ;;  %v294_v15 = vadd.f32 0.00028619796, %v293_v6  ;;  %v172_v6 = vpop.f32.mrf.mxu1 }
  0x95   :  { %v371_v12 = vmul.f32 %v2292_v8, %v2292_v8  ;;  %v334_v22 = vadd.f32 0.00028619796, %v333_v11  ;;  %v2321_v39 = vmul.f32 0.70710677, %v2312_v28 }
  0x96   :  { %v306_v10 = vmul.f32 %v305_v7, %v2276_v62  ;;  %v2299_v13 = vmul.f32 0.70710677, %v2287_v4  ;;  %v346_v14 = vmul.f32 %v345_v9, %v2278_v0  ;;  %v295_v26 = vmul.f32 %v294_v15, %v2276_v62 }
  0x97   :  { %v2302_v17 = vmin.f32 %v371_v12, 16.0  ;;  %v335_v32 = vmul.f32 %v334_v22, %v2278_v0  ;;  %v611_v48 = vmul.f32 %v2321_v39, %v2321_v39  ;;  %v173_v15 = vadd.f32 %v172_v6, %v43_v51 }
  0x98   :  { %v307_v16 = vadd.f32 0.014752088, %v306_v10  ;;  %v411_v18 = vmul.f32 %v2299_v13, %v2299_v13  ;;  %v347_v19 = vadd.f32 0.014752088, %v346_v14  ;;  %v296_v37 = vadd.f32 0.0036580483, %v295_v26 }
  0x99   :  { %v384_v23 = vmul.f32 3.8918573e-05, %v2302_v17  ;;  %v373_v34 = vmul.f32 2.1237322e-06, %v2302_v17  ;;  %v336_v42 = vadd.f32 0.0036580483, %v335_v32 }
  0x9a   :  { %v308_v21 = vmul.f32 %v307_v16, %v2276_v62  ;;  %v348_v24 = vmul.f32 %v347_v19, %v2278_v0  ;;  %v2309_v25 = vmin.f32 %v411_v18, 16.0  ;;  %v297_v46 = vmul.f32 %v296_v37, %v2276_v62 }
  0x9b   :  { %v385_v30 = vadd.f32 0.001143296, %v384_v23  ;;  %v374_v43 = vadd.f32 0.00028619796, %v373_v34  ;;  %v337_v59 = vmul.f32 %v336_v42, %v2278_v0  ;;  %v2335_v5 = vmin.f32 %v611_v48, 16.0 }
  0x9c   :  { %v309_v27 = vadd.f32 0.112945676, %v308_v21  ;;  %v349_v29 = vadd.f32 0.112945676, %v348_v24  ;;  %v424_v36 = vmul.f32 3.8918573e-05, %v2309_v25 }
  0x9d   :  { %v386_v35 = vmul.f32 %v385_v30, %v2302_v17  ;;  %v375_v61 = vmul.f32 %v374_v43, %v2302_v17  ;;  %v298_v63 = vadd.f32 0.05243302, %v297_v46  ;;  %v413_v3 = vmul.f32 2.1237322e-06, %v2309_v25 }
  0x9e   :  { %v310_v31 = vmul.f32 %v309_v27, %v2276_v62  ;;  %v350_v33 = vmul.f32 %v349_v29, %v2278_v0  ;;  %v425_v45 = vadd.f32 0.001143296, %v424_v36  ;;  %v338_v11 = vadd.f32 0.05243302, %v337_v59 }
  0x9f   :  { %v387_v41 = vadd.f32 0.014752088, %v386_v35  ;;  %v376_v12 = vadd.f32 0.0036580483, %v375_v61  ;;  %v299_v16 = vmul.f32 %v298_v63, %v2276_v62  ;;  %v414_v18 = vadd.f32 0.00028619796, %v413_v3  ;;  %v200_v63 = vpop.f32.mrf.mxu3 }
  0xa0   :  { %v311_v38 = vadd.f32 0.4994258, %v310_v31  ;;  %v351_v40 = vadd.f32 0.4994258, %v350_v33  ;;  %v426_v54 = vmul.f32 %v425_v45, %v2309_v25  ;;  %v624_v19 = vmul.f32 3.8918573e-05, %v2335_v5 }
  0xa1   :  { %v388_v44 = vmul.f32 %v387_v41, %v2302_v17  ;;  %v339_v21 = vmul.f32 %v338_v11, %v2278_v0  ;;  %v377_v23 = vmul.f32 %v376_v12, %v2302_v17  ;;  %v300_v24 = vadd.f32 0.18741608, %v299_v16 }
  0xa2   :  { %v312_v47 = vmul.f32 %v311_v38, %v2276_v62  ;;  %v352_v50 = vmul.f32 %v351_v40, %v2278_v0  ;;  %v427_v10 = vadd.f32 0.014752088, %v426_v54  ;;  %v415_v26 = vmul.f32 %v414_v18, %v2309_v25 }
  0xa3   :  { %v389_v52 = vadd.f32 0.112945676, %v388_v44  ;;  %v625_v27 = vadd.f32 0.001143296, %v624_v19  ;;  %v2350_v51 = vmul.f32 0.70710677, %v173_v15  ;;  %v301_v36 = vmul.f32 %v300_v24, %v2276_v62 }
  0xa4   :  { %v2332_v2 = vadd.f32 1.0, %v312_v47  ;;  %v2337_v7 = vadd.f32 1.0, %v352_v50  ;;  %v428_v14 = vmul.f32 %v427_v10, %v2309_v25  ;;  %v340_v32 = vadd.f32 0.18741608, %v339_v21 }
  0xa5   :  { %v390_v9 = vmul.f32 %v389_v52, %v2302_v17  ;;  %v378_v34 = vadd.f32 0.05243302, %v377_v23  ;;  %v626_v35 = vmul.f32 %v625_v27, %v2335_v5  ;;  %v416_v37 = vadd.f32 0.0036580483, %v415_v26 }
  0xa6   :  { %2053 = vrcp.f32 %v2332_v2  ;;  %v429_v22 = vadd.f32 0.112945676, %v428_v14  ;;  %v613_v38 = vmul.f32 2.1237322e-06, %v2335_v5  ;;  %v651_v40 = vmul.f32 %v2350_v51, %v2350_v51 }
  0xa7   :  { %2055 = vrcp.f32 %v2337_v7  ;;  %v391_v20 = vadd.f32 0.4994258, %v390_v9  ;;  %v627_v44 = vadd.f32 0.014752088, %v626_v35  ;;  %v2368_v45 = vmul.f32 0.5, %v2258_v53  ;;  %v186_v53 = vpop.f32.mrf.mxu2 }
  0xa8   :  { %v430_v30 = vmul.f32 %v429_v22, %v2309_v25  ;;  %v2371_v46 = vmul.f32 0.5, %v2262_v55  ;;  %v341_v62 = vmul.f32 %v340_v32, %v2278_v0  ;;  %v2377_v48 = vmul.f32 0.5, %v2282_v1 }
  0xa9   :  { %v392_v29 = vmul.f32 %v391_v20, %v2302_v17  ;;  %v379_v50 = vmul.f32 %v378_v34, %v2302_v17  ;;  %v2381_v52 = vmul.f32 0.5, %v2287_v4  ;;  %v628_v54 = vmul.f32 %v627_v44, %v2335_v5 }
  0xaa   :  { %v431_v43 = vadd.f32 0.4994258, %v430_v30  ;;  %v302_v59 = vadd.f32 1.1283791, %v301_v36  ;;  %v417_v55 = vmul.f32 %v416_v37, %v2309_v25  ;;  %v2386_v61 = vmul.f32 0.5, %v2312_v28  ;;  %v1992_v36 = vld [vmem:[%s3310_s3 + $0x38] sm:$0xff] }
  0xab   :  { %v2365_v42 = vadd.f32 1.0, %v392_v29  ;;  %v614_v0 = vadd.f32 0.00028619796, %v613_v38  ;;  %v2390_v6 = vmin.f32 %v651_v40, 16.0  ;;  %v342_v4 = vadd.f32 1.1283791, %v341_v62  ;;  %1487 = vmatpush.bf16.msra.mxu0 %v1992_v36 }
  0xac   :  { %v2354_v31 = vpop.eup %2053  ;;  %v432_v1 = vmul.f32 %v431_v43, %v2309_v25  ;;  %v2392_v10 = vmul.f32 0.5, %v173_v15  ;;  %v187_v11 = vadd.f32 %v186_v53, %v44_v58  ;;  %v323_v12 = vand.u32 2147483647, %v2332_v2  ;;  %v2000_v37 = vld [vmem:[%s3310_s3 + $0x78] sm:$0xff] }
  0xad   :  { %v2356_v33 = vpop.eup %2055  ;;  %v315_v41 = vmul.f32 %v2354_v31, %v2332_v2  ;;  %2057 = vrcp.f32 %v2365_v42  ;;  %v380_v28 = vadd.f32 0.18741608, %v379_v50  ;;  %v629_v14 = vadd.f32 0.112945676, %v628_v54  ;;  %1501 = vmatpush.bf16.msra.mxu1 %v2000_v37 }
  0xae   :  { %v355_v47 = vmul.f32 %v2356_v33, %v2337_v7  ;;  %v2399_v16 = vadd.f32 %v200_v63, %v45_v60  ;;  %v2402_v18 = vmul.f32 %v302_v59, %v2265_v56  ;;  %vm319_vm1 = vweird.f32 %v2332_v2 }
  0xaf   :  { %v316_v3 = vsub.f32 1.0, %v315_v41  ;;  %v325_v19 = vand.u32 2147483648, %v2332_v2  ;;  %v418_v15 = vadd.f32 0.05243302, %v417_v55  ;;  %v2407_v21 = vadd.f32 1.0, %v432_v1 }
  0xb0   :  { %v356_v9 = vsub.f32 1.0, %v355_v47  ;;  %v615_v58 = vmul.f32 %v614_v0, %v2335_v5  ;;  %v664_v22 = vmul.f32 3.8918573e-05, %v2390_v6  ;;  %v2412_v23 = vmul.f32 %v342_v4, %v2268_v57 }
  0xb1   :  { %v317_v20 = vmul.f32 %v2354_v31, %v316_v3  ;;  %v363_v56 = vand.u32 2147483647, %v2337_v7  ;;  %v2416_v24 = vmul.f32 0.70710677, %v187_v11  ;;  %vm2420_vm2 = vcmp.eq.f32.partialorder %v323_v12, 8.507059e+37 }
  0xb2   :  { %v357_v60 = vmul.f32 %v2356_v33, %v356_v9  ;;  %v365_v29 = vand.u32 2147483648, %v2337_v7  ;;  %v381_v30 = vmul.f32 %v380_v28, %v2302_v17  ;;  %v630_v32 = vmul.f32 %v629_v14, %v2335_v5 }
  0xb3   :  { %v2418_v26 = vpop.eup %2057  ;;  %v665_v57 = vadd.f32 0.001143296, %v664_v22  ;;  %vm320_vm3 = vweird.f32 %v2354_v31  ;;  %v326_v34 = vor.u32 1.1754944e-38, %v325_v19  ;;  %vm360_vm4 = vweird.f32 %v2356_v33 }
  0xb4   :  { %v419_v35 = vmul.f32 %v418_v15, %v2309_v25  ;;  %v318_v17 = vadd.f32 %v2354_v31, %v317_v20  ;;  %2059 = vrcp.f32 %v2407_v21  ;;  %v616_v38 = vadd.f32 0.0036580483, %v615_v58  ;;  %vm2450_vm6 = vmor %vm319_vm1, %vm320_vm3 }
  0xb5   :  { %v666_v40 = vmul.f32 %v665_v57, %v2390_v6  ;;  %v358_v41 = vadd.f32 %v2356_v33, %v357_v60  ;;  %v395_v43 = vmul.f32 %v2418_v26, %v2365_v42  ;;  %v653_v44 = vmul.f32 2.1237322e-06, %v2390_v6 }
  0xb6   :  { %v691_v62 = vmul.f32 %v2416_v24, %v2416_v24  ;;  %vm359_vm5 = vweird.f32 %v2337_v7  ;;  %v382_v47 = vadd.f32 1.1283791, %v381_v30  ;;  %v631_v50 = vadd.f32 0.4994258, %v630_v32 }
  0xb7   :  { %v667_v54 = vadd.f32 0.014752088, %v666_v40  ;;  %vm2454_vm7 = vcmp.eq.f32.partialorder %v363_v56, 8.507059e+37  ;;  %v366_v55 = vor.u32 1.1754944e-38, %v365_v29  ;;  %v420_v0 = vadd.f32 0.18741608, %v419_v35  ;;  %vm2465_vm8 = vmor %vm359_vm5, %vm360_vm4 }
  0xb8   :  { %v2458_v63 = vmin.f32 %v691_v62, 16.0  ;;  %v322_v7 = vsel %vm2450_vm6, %v2354_v31, %v318_v17  ;;  %v617_v3 = vmul.f32 %v616_v38, %v2335_v5  ;;  %v2470_v1 = vmul.f32 0.5, %v187_v11 }
  0xb9   :  { %v2473_v4 = vmul.f32 0.70710677, %v2399_v16  ;;  %v362_v9 = vsel %vm2465_vm8, %v2356_v33, %v358_v41  ;;  %v396_v12 = vsub.f32 1.0, %v395_v43  ;;  %v654_v28 = vadd.f32 0.00028619796, %v653_v44  ;;  %v212_v41 = vpop.f32.mrf.mxu0 }
  0xba   :  { %v668_v31 = vmul.f32 %v667_v54, %v2390_v6  ;;  %v2479_v14 = vpop.eup %2059  ;;  %v2482_v19 = vmul.f32 %v382_v47, %v2292_v8  ;;  %v403_v15 = vand.u32 2147483647, %v2365_v42  ;;  %v632_v11 = vmul.f32 %v631_v50, %v2335_v5 }
  0xbb   :  { %v704_v20 = vmul.f32 3.8918573e-05, %v2458_v63  ;;  %v327_v58 = vsel %vm2420_vm2, %v326_v34, %v322_v7  ;;  %v405_v33 = vand.u32 2147483648, %v2365_v42  ;;  %v421_v22 = vmul.f32 %v420_v0, %v2309_v25 }
  0xbc   :  { %v669_v60 = vadd.f32 0.112945676, %v668_v31  ;;  %v367_v56 = vsel %vm2454_vm7, %v366_v55, %v362_v9  ;;  %v618_v29 = vadd.f32 0.05243302, %v617_v3  ;;  %v731_v30 = vmul.f32 %v2473_v4, %v2473_v4 }
  0xbd   :  { %v705_v8 = vadd.f32 0.001143296, %v704_v20  ;;  %v397_v32 = vmul.f32 %v2418_v26, %v396_v12  ;;  %v435_v57 = vmul.f32 %v2479_v14, %v2407_v21  ;;  %v655_v27 = vmul.f32 %v654_v28, %v2390_v6 }
  0xbe   :  { %v670_v34 = vmul.f32 %v669_v60, %v2390_v6  ;;  %v2500_v35 = vadd.f32 1.0, %v632_v11  ;;  %v2503_v36 = vmin.f32 %v731_v30, 16.0  ;;  %v46_v37 = vperm.slane %v2254_v49, 4 }
  0xbf   :  { %v706_v25 = vmul.f32 %v705_v8, %v2458_v63  ;;  %v328_v17 = vmul.f32 %v327_v58, %v2402_v18  ;;  %vm399_vm9 = vweird.f32 %v2365_v42  ;;  %v406_v38 = vor.u32 1.1754944e-38, %v405_v33 }
  0xc0   :  { %v422_v40 = vadd.f32 1.1283791, %v421_v22  ;;  %v368_v43 = vmul.f32 %v367_v56, %v2412_v23  ;;  %vm400_vm10 = vweird.f32 %v2418_v26  ;;  %vm2510_vm11 = vcmp.eq.f32.partialorder %v403_v15, 8.507059e+37  ;;  %v226_v15 = vpop.f32.mrf.mxu1 }
  0xc1   :  { %v671_v62 = vadd.f32 0.4994258, %v670_v34  ;;  %v707_v47 = vadd.f32 0.014752088, %v706_v25  ;;  %v398_v50 = vadd.f32 %v2418_v26, %v397_v32  ;;  %v436_v54 = vsub.f32 1.0, %v435_v57  ;;  %vm2534_vm12 = vmor %vm399_vm9, %vm400_vm10 }
  0xc2   :  { %v619_v18 = vmul.f32 %v618_v29, %v2335_v5  ;;  %v656_v53 = vadd.f32 0.0036580483, %v655_v27  ;;  %2061 = vrcp.f32 %v2500_v35  ;;  %v744_v23 = vmul.f32 3.8918573e-05, %v2503_v36 }
  0xc3   :  { %v708_v59 = vmul.f32 %v707_v47, %v2458_v63  ;;  %v2521_v55 = vadd.f32 %v212_v41, %v46_v37  ;;  %v1696_v0 = vclamps-f32 %v328_v17, 1.0  ;;  %v2524_v7 = vmul.f32 %v422_v40, %v2299_v13 }
  0xc4   :  { %v693_v2 = vmul.f32 2.1237322e-06, %v2458_v63  ;;  %v47_v3 = vperm.slane %v2254_v49, 5  ;;  %v1697_v9 = vclamps-f32 %v368_v43, 1.0  ;;  %v443_v12 = vand.u32 2147483647, %v2407_v21 }
  0xc5   :  { %v672_v28 = vmul.f32 %v671_v62, %v2390_v6  ;;  %v709_v31 = vadd.f32 0.112945676, %v708_v59  ;;  %vm439_vm13 = vweird.f32 %v2407_v21  ;;  %v445_v13 = vand.u32 2147483648, %v2407_v21 }
  0xc6   :  { %v620_v20 = vadd.f32 0.18741608, %v619_v18  ;;  %v745_v58 = vadd.f32 0.001143296, %v744_v23  ;;  %v402_v33 = vsel %vm2534_vm12, %v2418_v26, %v398_v50  ;;  %v437_v22 = vmul.f32 %v2479_v14, %v436_v54 }
  0xc7   :  { %v657_v60 = vmul.f32 %v656_v53, %v2390_v6  ;;  %v2546_v42 = vmul.f32 0.70710677, %v2521_v55  ;;  %v931_v56 = vadd.f32 1.0, %v1696_v0  ;;  %v694_v29 = vadd.f32 0.00028619796, %v693_v2 }
  0xc8   :  { %v710_v8 = vmul.f32 %v709_v31, %v2458_v63  ;;  %v2551_v30 = vadd.f32 %v226_v15, %v47_v3  ;;  %v2553_v32 = vpop.eup %2061  ;;  %v932_v57 = vadd.f32 1.0, %v1697_v9  ;;  %v2555_v27 = vadd.f32 1.0, %v672_v28 }
  0xc9   :  { %v733_v26 = vmul.f32 2.1237322e-06, %v2503_v36  ;;  %v746_v34 = vmul.f32 %v745_v58, %v2503_v36  ;;  %v407_v25 = vsel %vm2510_vm11, %v406_v38, %v402_v33  ;;  %vm440_vm14 = vweird.f32 %v2479_v14 }
  0xca   :  { %v621_v17 = vmul.f32 %v620_v20, %v2335_v5  ;;  %v711_v40 = vadd.f32 0.4994258, %v710_v8  ;;  %v438_v41 = vadd.f32 %v2479_v14, %v437_v22  ;;  %v658_v43 = vadd.f32 0.05243302, %v657_v60  ;;  %vm2582_vm15 = vmor %vm439_vm13, %vm440_vm14 }
  0xcb   :  { %v747_v62 = vadd.f32 0.014752088, %v746_v34  ;;  %v451_v47 = vmul.f32 %v2546_v42, %v2546_v42  ;;  %v635_v50 = vmul.f32 %v2553_v32, %v2500_v35  ;;  %v695_v54 = vmul.f32 %v694_v29, %v2458_v63 }
  0xcc   :  { %v712_v44 = vmul.f32 %v711_v40, %v2458_v63  ;;  %v2571_v38 = vmul.f32 0.70710677, %v2551_v30  ;;  %2063 = vrcp.f32 %v2555_v27  ;;  %v734_v5 = vadd.f32 0.00028619796, %v733_v26 }
  0xcd   :  { %v748_v18 = vmul.f32 %v747_v62, %v2503_v36  ;;  %v2575_v53 = vmin.f32 %v451_v47, 16.0  ;;  %v408_v59 = vmul.f32 %v407_v25, %v2482_v19  ;;  %vm2586_vm0 = vcmp.eq.f32.partialorder %v443_v12, 8.507059e+37 }
  0xce   :  { %v446_v2 = vor.u32 1.1754944e-38, %v445_v13  ;;  %v622_v9 = vadd.f32 1.1283791, %v621_v17  ;;  %v442_v28 = vsel %vm2582_vm15, %v2479_v14, %v438_v41  ;;  %v659_v19 = vmul.f32 %v658_v43, %v2390_v6 }
  0xcf   :  { %v2594_v31 = vadd.f32 1.0, %v712_v44  ;;  %v749_v15 = vadd.f32 0.112945676, %v748_v18  ;;  %v636_v21 = vsub.f32 1.0, %v635_v50  ;;  %v696_v11 = vadd.f32 0.0036580483, %v695_v54 }
  0xd0   :  { %v464_v20 = vmul.f32 3.8918573e-05, %v2575_v53  ;;  %v491_v12 = vmul.f32 %v2571_v38, %v2571_v38  ;;  %v2600_v58 = vmul.f32 %v931_v56, %v2368_v45  ;;  %v2603_v13 = vmul.f32 %v932_v57, %v2371_v46 }
  0xd1   :  { %2065 = vrcp.f32 %v2594_v31  ;;  %v735_v14 = vmul.f32 %v734_v5, %v2503_v36  ;;  %v1698_v33 = vclamps-f32 %v408_v59, 1.0  ;;  %v2608_v22 = vmul.f32 %v622_v9, %v2321_v39  ;;  %v240_v9 = vpop.f32.mrf.mxu2 }
  0xd2   :  { %v2611_v60 = vmul.f32 0.5, %v2399_v16  ;;  %v750_v29 = vmul.f32 %v749_v15, %v2503_v36  ;;  %v2614_v8 = vpop.eup %2063  ;;  %v447_v45 = vsel %vm2586_vm0, %v446_v2, %v442_v28  ;;  %vm639_vm1 = vweird.f32 %v2500_v35 }
  0xd3   :  { %v643_v46 = vand.u32 2147483647, %v2500_v35  ;;  %v660_v56 = vadd.f32 0.18741608, %v659_v19  ;;  %v465_v57 = vadd.f32 0.001143296, %v464_v20  ;;  %v637_v26 = vmul.f32 %v2553_v32, %v636_v21 }
  0xd4   :  { %v697_v39 = vmul.f32 %v696_v11, %v2458_v63  ;;  %v751_v34 = vadd.f32 0.4994258, %v750_v29  ;;  %v2622_v16 = vmin.f32 %v491_v12, 16.0  ;;  %v645_v25 = vand.u32 2147483648, %v2500_v35 }
  0xd5   :  { %v736_v17 = vadd.f32 0.0036580483, %v735_v14  ;;  %v453_v40 = vmul.f32 2.1237322e-06, %v2575_v53  ;;  %v466_v41 = vmul.f32 %v465_v57, %v2575_v53  ;;  %v933_v43 = vadd.f32 1.0, %v1698_v33 }
  0xd6   :  { %v2628_v62 = vmul.f32 %v447_v45, %v2524_v7  ;;  %v675_v47 = vmul.f32 %v2614_v8, %v2555_v27  ;;  %v752_v50 = vmul.f32 %v751_v34, %v2503_v36  ;;  %vm2635_vm2 = vcmp.eq.f32.partialorder %v643_v46, 8.507059e+37  ;;  %v1998_v45 = vld [vmem:[%s3310_s3 + $0x68] sm:$0xff] }
  0xd7   :  { %v2633_v54 = vpop.eup %2065  ;;  %v661_v5 = vmul.f32 %v660_v56, %v2390_v6  ;;  %v467_v18 = vadd.f32 0.014752088, %v466_v41  ;;  %v504_v59 = vmul.f32 3.8918573e-05, %v2622_v16  ;;  %v48_v23 = vperm.slane %v2254_v49, 6  ;;  %v1991_v41 = vld [vmem:[%s3310_s3 + $0x30] sm:$0xff] }
  0xd8   :  { %v638_v7 = vadd.f32 %v2553_v32, %v637_v26  ;;  %vm640_vm3 = vweird.f32 %v2553_v32  ;;  %v698_v0 = vadd.f32 0.05243302, %v697_v39  ;;  %v715_v2 = vmul.f32 %v2633_v54, %v2594_v31  ;;  %1488 = vmatpush.bf16.msra.mxu0 %v1991_v41 }
  0xd9   :  { %v737_v28 = vmul.f32 %v736_v17, %v2503_v36  ;;  %v2647_v19 = vadd.f32 1.0, %v752_v50  ;;  %v454_v15 = vadd.f32 0.00028619796, %v453_v40  ;;  %v468_v6 = vmul.f32 %v467_v18, %v2575_v53  ;;  %vm2663_vm4 = vmor %vm639_vm1, %vm640_vm3 }
  0xda   :  { %v2651_v21 = vmul.f32 %v933_v43, %v2377_v48  ;;  %v646_v11 = vor.u32 1.1754944e-38, %v645_v25  ;;  %v676_v20 = vsub.f32 1.0, %v675_v47  ;;  %v505_v12 = vadd.f32 0.001143296, %v504_v59 }
  0xdb   :  { %v1699_v14 = vclamps-f32 %v2628_v62, 1.0  ;;  %v716_v33 = vsub.f32 1.0, %v715_v2  ;;  %2067 = vrcp.f32 %v2647_v19  ;;  %v2657_v29 = vadd.f32 %v240_v9, %v48_v23  ;;  %v2016_v2 = vld [vmem:[%s3310_s3 + $0xf8] sm:$0xff] }
  0xdc   :  { %v2667_v48 = vadd.f32 1.1283791, %v661_v5  ;;  %v699_v46 = vmul.f32 %v698_v0, %v2458_v63  ;;  %v469_v56 = vadd.f32 0.112945676, %v468_v6  ;;  %v493_v57 = vmul.f32 2.1237322e-06, %v2622_v16  ;;  %1529 = vmatpush.bf16.msra.mxu3 %v2016_v2 }
  0xdd   :  { %v642_v26 = vsel %vm2663_vm4, %v2553_v32, %v638_v7  ;;  %v738_v39 = vadd.f32 0.05243302, %v737_v28  ;;  %v455_v34 = vmul.f32 %v454_v15, %v2575_v53  ;;  %v506_v35 = vmul.f32 %v505_v12, %v2622_v16  ;;  %v1999_v32 = vld [vmem:[%s3310_s3 + $0x70] sm:$0xff]  ;;  %v2008_v0 = vld [vmem:[%s3310_s3 + $0xb8] sm:$0xff] }
  0xde   :  { %v677_v25 = vmul.f32 %v2614_v8, %v676_v20  ;;  %vm679_vm5 = vweird.f32 %v2555_v27  ;;  %v683_v17 = vand.u32 2147483647, %v2555_v27  ;;  %v470_v40 = vmul.f32 %v469_v56, %v2575_v53  ;;  %1502 = vmatpush.bf16.msra.mxu1 %v1999_v32  ;;  %1515 = vmatpush.bf16.msra.mxu2 %v2008_v0 }
  0xdf   :  { %v685_v43 = vand.u32 2147483648, %v2555_v27  ;;  %v717_v47 = vmul.f32 %v2633_v54, %v716_v33  ;;  %v507_v50 = vadd.f32 0.014752088, %v506_v35  ;;  %v2689_v5 = vmul.f32 0.70710677, %v2657_v29  ;;  %v1990_v33 = vld [vmem:[%s3310_s3 + $0x28] sm:$0xff] }
  0xe0   :  { %v647_v18 = vsel %vm2635_vm2, %v646_v11, %v642_v26  ;;  %vm680_vm6 = vweird.f32 %v2614_v8  ;;  %v700_v59 = vadd.f32 0.18741608, %v699_v46  ;;  %v494_v7 = vadd.f32 0.00028619796, %v493_v57  ;;  %1489 = vmatpush.bf16.msra.mxu0 %v1990_v33 }
  0xe1   :  { %v2700_v9 = vpop.eup %2067  ;;  %v739_v28 = vmul.f32 %v738_v39, %v2503_v36  ;;  %v456_v44 = vadd.f32 0.0036580483, %v455_v34  ;;  %v508_v15 = vmul.f32 %v507_v50, %v2622_v16  ;;  %v531_v6 = vmul.f32 %v2689_v5, %v2689_v5  ;;  %vm2731_vm9 = vmor %vm679_vm5, %vm680_vm6 }
  0xe2   :  { %v678_v11 = vadd.f32 %v2614_v8, %v677_v25  ;;  %vm720_vm7 = vweird.f32 %v2633_v54  ;;  %v471_v20 = vadd.f32 0.4994258, %v470_v40  ;;  %v49_v12 = vperm.slane %v2254_v49, 7  ;;  %v254_v40 = vpop.f32.mrf.mxu3  ;;  %1503 = vmatpush.bf16.msra.mxu1 %v1998_v45 }
  0xe3   :  { %v718_v46 = vadd.f32 %v2633_v54, %v717_v47  ;;  %v755_v56 = vmul.f32 %v2700_v9, %v2647_v19  ;;  %v509_v57 = vadd.f32 0.112945676, %v508_v15  ;;  %v2718_v26 = vmin.f32 %v531_v6, 16.0 }
  0xe4   :  { %vm2720_vm8 = vcmp.eq.f32.partialorder %v683_v17, 8.507059e+37  ;;  %v701_v34 = vmul.f32 %v700_v59, %v2458_v63  ;;  %v725_v35 = vand.u32 2147483648, %v2594_v31  ;;  %v495_v25 = vmul.f32 %v494_v7, %v2622_v16 }
  0xe5   :  { %v686_v17 = vor.u32 1.1754944e-38, %v685_v43  ;;  %vm719_vm10 = vweird.f32 %v2594_v31  ;;  %v723_v63 = vand.u32 2147483647, %v2594_v31  ;;  %v457_v32 = vmul.f32 %v456_v44, %v2575_v53 }
  0xe6   :  { %v682_v47 = vsel %vm2731_vm9, %v2614_v8, %v678_v11  ;;  %vm2743_vm11 = vmor %vm719_vm10, %vm720_vm7  ;;  %v740_v27 = vadd.f32 0.18741608, %v739_v28  ;;  %v472_v59 = vmul.f32 %v471_v20, %v2575_v53  ;;  %v544_v43 = vmul.f32 3.8918573e-05, %v2718_v26 }
  0xe7   :  { %v722_v31 = vsel %vm2743_vm11, %v2633_v54, %v718_v46  ;;  %v756_v7 = vsub.f32 1.0, %v755_v56  ;;  %v510_v0 = vmul.f32 %v509_v57, %v2622_v16  ;;  %v2755_v8 = vadd.f32 %v254_v40, %v49_v12 }
  0xe8   :  { %v648_v2 = vmul.f32 %v647_v18, %v2608_v22  ;;  %v702_v44 = vadd.f32 1.1283791, %v701_v34  ;;  %v726_v15 = vor.u32 1.1754944e-38, %v725_v35  ;;  %v496_v28 = vadd.f32 0.0036580483, %v495_v25 }
  0xe9   :  { %v687_v6 = vsel %vm2720_vm8, %v686_v17, %v682_v47  ;;  %vm724_vm12 = vcmp.eq.f32.partialorder %v723_v63, 8.507059e+37  ;;  %v458_v11 = vadd.f32 0.05243302, %v457_v32  ;;  %v545_v20 = vadd.f32 0.001143296, %v544_v43 }
  0xea   :  { %v663_v54 = vmul.f32 %v2667_v48, %v2350_v51  ;;  %v727_v33 = vsel %vm724_vm12, %v726_v15, %v722_v31  ;;  %v741_v45 = vmul.f32 %v740_v27, %v2503_v36  ;;  %v2763_v46 = vadd.f32 1.0, %v472_v59  ;;  %v214_v48 = vpop.f32.mrf.mxu0 }
  0xeb   :  { %v757_v56 = vmul.f32 %v2700_v9, %v756_v7  ;;  %v511_v22 = vadd.f32 0.4994258, %v510_v0  ;;  %v546_v18 = vmul.f32 %v545_v20, %v2718_v26  ;;  %v2768_v57 = vmul.f32 0.70710677, %v2755_v8 }
  0xec   :  { %v934_v39 = vadd.f32 1.0, %v1699_v14  ;;  %v688_v34 = vmul.f32 %v687_v6, %v663_v54  ;;  %v703_v35 = vmul.f32 %v702_v44, %v2416_v24  ;;  %v497_v51 = vmul.f32 %v496_v28, %v2622_v16  ;;  %v2007_v28 = vld [vmem:[%s3310_s3 + $0xb0] sm:$0xff] }
  0xed   :  { %v1704_v36 = vclamps-f32 %v648_v2, 1.0  ;;  %v459_v25 = vmul.f32 %v458_v11, %v2575_v53  ;;  %v547_v40 = vadd.f32 0.014752088, %v546_v18  ;;  %v571_v41 = vmul.f32 %v2768_v57, %v2768_v57  ;;  %1516 = vmatpush.bf16.msra.mxu2 %v2007_v28 }
  0xee   :  { %v728_v17 = vmul.f32 %v727_v33, %v703_v35  ;;  %v742_v63 = vadd.f32 1.1283791, %v741_v45  ;;  %2069 = vrcp.f32 %v2763_v46  ;;  %v533_v62 = vmul.f32 2.1237322e-06, %v2718_v26 }
  0xef   :  { %v758_v14 = vadd.f32 %v2700_v9, %v757_v56  ;;  %vm760_vm13 = vweird.f32 %v2700_v9  ;;  %v512_v24 = vmul.f32 %v511_v22, %v2622_v16  ;;  %v2784_v32 = vadd.f32 %v214_v48, %v46_v37  ;;  %v1989_v22 = vld [vmem:[%s3310_s3 + $0x20] sm:$0xff]  ;;  %v242_v37 = vpop.f32.mrf.mxu2 }
  0xf0   :  { %v1705_v47 = vclamps-f32 %v688_v34, 1.0  ;;  %v763_v50 = vand.u32 2147483647, %v2647_v19  ;;  %v765_v27 = vand.u32 2147483648, %v2647_v19  ;;  %v498_v59 = vadd.f32 0.05243302, %v497_v51  ;;  %1490 = vmatpush.bf16.msra.mxu0 %v1989_v22 }
  0xf1   :  { %vm759_vm14 = vweird.f32 %v2647_v19  ;;  %v460_v43 = vadd.f32 0.18741608, %v459_v25  ;;  %v548_v31 = vmul.f32 %v547_v40, %v2718_v26  ;;  %v2790_v7 = vmin.f32 %v571_v41, 16.0  ;;  %v2015_v19 = vld [vmem:[%s3310_s3 + $0xf0] sm:$0xff]  ;;  %v228_v40 = vpop.f32.mrf.mxu1  ;;  %v2014_v41 = vld [vmem:[%s3310_s3 + $0xe8] sm:$0xff] }
  0xf2   :  { %v2793_v0 = vmul.f32 %v934_v39, %v2381_v52  ;;  %v939_v2 = vadd.f32 1.0, %v1704_v36  ;;  %v1706_v44 = vclamps-f32 %v728_v17, 1.0  ;;  %vm2795_vm15 = vmor %vm759_vm14, %vm760_vm13  ;;  %v534_v15 = vadd.f32 0.00028619796, %v533_v62  ;;  %1530 = vmatpush.bf16.msra.mxu3 %v2015_v19  ;;  %v1995_v22 = vld [vmem:[%s3310_s3 + $0x50] sm:$0xff] }
  0xf3   :  { %v762_v52 = vsel %vm2795_vm15, %v2700_v9, %v758_v14  ;;  %v2808_v6 = vadd.f32 1.0, %v512_v24  ;;  %v584_v11 = vmul.f32 3.8918573e-05, %v2790_v7  ;;  %v2812_v20 = vmul.f32 0.70710677, %v2784_v32  ;;  %v1997_v9 = vld [vmem:[%s3310_s3 + $0x60] sm:$0xff] }
  0xf4   :  { %v2814_v54 = vpop.eup %2069  ;;  %v940_v33 = vadd.f32 1.0, %v1705_v47  ;;  %vm764_vm0 = vcmp.eq.f32.partialorder %v763_v50, 8.507059e+37  ;;  %v766_v45 = vor.u32 1.1754944e-38, %v765_v27  ;;  %v499_v56 = vmul.f32 %v498_v59, %v2622_v16  ;;  %1504 = vmatpush.bf16.msra.mxu1 %v1997_v9  ;;  %v1988_v24 = vld [vmem:[%s3310_s3 + $0x18] sm:$0xff] }
  0xf5   :  { %v461_v18 = vmul.f32 %v460_v43, %v2575_v53  ;;  %v549_v39 = vadd.f32 0.112945676, %v548_v31  ;;  %v585_v34 = vadd.f32 0.001143296, %v584_v11  ;;  %v771_v35 = vmul.f32 %v2812_v20, %v2812_v20  ;;  %v2006_v53 = vld [vmem:[%s3310_s3 + $0xa8] sm:$0xff]  ;;  %v1996_v47 = vld [vmem:[%s3310_s3 + $0x58] sm:$0xff]  ;;  %1491 = vmatpush.bf16.msra.mxu0 %v1988_v24 }
  0xf6   :  { %v2827_v51 = vmul.f32 %v939_v2, %v2386_v61  ;;  %v743_v48 = vmul.f32 %v742_v63, %v2473_v4  ;;  %v767_v36 = vsel %vm764_vm0, %v766_v45, %v762_v52  ;;  %v2831_v25 = vmul.f32 0.5, %v2521_v55  ;;  %1517 = vmatpush.bf16.msra.mxu2 %v2006_v53  ;;  %1531 = vmatpush.bf16.msra.mxu3 %v2014_v41  ;;  %v1986_v24 = vld [vmem:[%s3310_s3 + $0x8] sm:$0xff] }
  0xf7   :  { %v941_v17 = vadd.f32 1.0, %v1706_v44  ;;  %v475_v61 = vmul.f32 %v2814_v54, %v2763_v46  ;;  %2071 = vrcp.f32 %v2808_v6  ;;  %v535_v4 = vmul.f32 %v534_v15, %v2718_v26  ;;  %v2005_v15 = vld [vmem:[%s3310_s3 + $0xa0] sm:$0xff] }
  0xf8   :  { %v2844_v55 = vmul.f32 %v940_v33, %v2392_v10  ;;  %v500_v63 = vadd.f32 0.18741608, %v499_v56  ;;  %v586_v62 = vmul.f32 %v585_v34, %v2790_v7  ;;  %v2847_v14 = vmin.f32 %v771_v35, 16.0  ;;  %1505 = vmatpush.bf16.msra.mxu1 %v1996_v47  ;;  %v1994_v47 = vld [vmem:[%s3310_s3 + $0x48] sm:$0xff] }
  0xf9   :  { %v768_v50 = vmul.f32 %v767_v36, %v743_v48  ;;  %v462_v27 = vadd.f32 1.1283791, %v461_v18  ;;  %v550_v59 = vmul.f32 %v549_v39, %v2718_v26  ;;  %v2858_v10 = vadd.f32 %v228_v40, %v47_v3  ;;  %v2004_v40 = vld [vmem:[%s3310_s3 + $0x98] sm:$0xff] }
  0xfa   :  { %v963_v43 = vpack.c.bf16 %v2827_v51, %v2600_v58  ;;  %v483_v31 = vand.u32 2147483647, %v2763_v46  ;;  %v2864_v2 = vmul.f32 0.5, %v2551_v30  ;;  %v773_v44 = vmul.f32 2.1237322e-06, %v2847_v14  ;;  %v2013_v30 = vld [vmem:[%s3310_s3 + $0xe0] sm:$0xff]  ;;  %1518 = vmatpush.bf16.msra.mxu2 %v2005_v15 }
  0xfb   :  { %v2871_v3 = vmul.f32 %v941_v17, %v2470_v1  ;;  %v476_v28 = vsub.f32 1.0, %v475_v61  ;;  %v485_v19 = vand.u32 2147483648, %v2763_v46  ;;  %v536_v52 = vadd.f32 0.0036580483, %v535_v4  ;;  %v1987_v1 = vld [vmem:[%s3310_s3 + $0x10] sm:$0xff]  ;;  %1532 = vmatpush.bf16.msra.mxu3 %v2013_v30 }
  0xfc   :  { %v964_v11 = vpack.c.bf16 %v2844_v55, %v2603_v13  ;;  %v501_v33 = vmul.f32 %v500_v63, %v2622_v16  ;;  %v587_v45 = vadd.f32 0.014752088, %v586_v62  ;;  %v784_v56 = vmul.f32 3.8918573e-05, %v2847_v14  ;;  %1492 = vmatpush.bf16.msra.mxu0 %v1987_v1  ;;  %1506 = vmatpush.bf16.msra.mxu1 %v1995_v22 }
  0xfd   :  { %v2887_v9 = vpop.eup %2071  ;;  %v1707_v18 = vclamps-f32 %v768_v50, 1.0  ;;  %v551_v39 = vadd.f32 0.4994258, %v550_v59  ;;  %v2890_v34 = vmul.f32 0.70710677, %v2858_v10  ;;  %v2894_v16 = vadd.f32 %v242_v37, %v48_v23  ;;  %v2012_v23 = vld [vmem:[%s3310_s3 + $0xd8] sm:$0xff] }
  0xfe   :  { %v2897_v35 = vmul.f32 %v462_v27, %v2546_v42  ;;  %vm479_vm1 = vweird.f32 %v2763_v46  ;;  %v573_v48 = vmul.f32 2.1237322e-06, %v2790_v7  ;;  %v774_v36 = vadd.f32 0.00028619796, %v773_v44  ;;  %1519 = vmatpush.bf16.msra.mxu2 %v2004_v40 }
  0xff   :  { %v965_v53 = vpack.c.bf16 %v2871_v3, %v2651_v21  ;;  %v477_v42 = vmul.f32 %v2814_v54, %v476_v28  ;;  %v2910_v41 = vor.u32 1.1754944e-38, %v485_v19  ;;  %v537_v17 = vmul.f32 %v536_v52, %v2718_v26  ;;  %1533 = vmatpush.bf16.msra.mxu3 %v2012_v23  ;;  %v2021_v3 = vld [vmem:[%s3310_s3 + $0x120] sm:$0xff] }
 0x100   :  { %v2913_v61 = vadd.f32 1.1283791, %v501_v33  ;;  %v515_v4 = vmul.f32 %v2887_v9, %v2808_v6  ;;  %v588_v63 = vmul.f32 %v587_v45, %v2790_v7  ;;  %v785_v62 = vadd.f32 0.001143296, %v784_v56  ;;  %1493 = vmatpush.bf16.msra.mxu0 %v1986_v24  ;;  %1507 = vmatpush.bf16.msra.mxu1 %v1994_v47  ;;  %v2011_v56 = vld [vmem:[%s3310_s3 + $0xd0] sm:$0xff]  ;;  %v2024_v24 = vld [vmem:[%s3310_s3 + $0x138] sm:$0xff] }
 0x101   :  { %v942_v50 = vadd.f32 1.0, %v1707_v18  ;;  %vm2924_vm2 = vcmp.eq.f32.partialorder %v483_v31, 8.507059e+37  ;;  %v552_v59 = vmul.f32 %v551_v39, %v2718_v26  ;;  %v811_v44 = vmul.f32 %v2890_v34, %v2890_v34  ;;  %v2003_v31 = vld [vmem:[%s3310_s3 + $0x90] sm:$0xff] }
 0x102   :  { %v2932_v37 = vmul.f32 0.70710677, %v2894_v16  ;;  %vm480_vm3 = vweird.f32 %v2814_v54  ;;  %v574_v15 = vadd.f32 0.00028619796, %v573_v48  ;;  %v775_v28 = vmul.f32 %v774_v36, %v2847_v14  ;;  %1520 = vmatpush.bf16.msra.mxu2 %v2003_v31  ;;  %v1985_v48 = vld [vmem:[%s3310_s3] sm:$0xff] }
 0x103   :  { %v786_v19 = vmul.f32 %v785_v62, %v2847_v14  ;;  %v478_v52 = vadd.f32 %v2814_v54, %v477_v42  ;;  %v523_v30 = vand.u32 2147483647, %v2808_v6  ;;  %v538_v33 = vadd.f32 0.05243302, %v537_v17  ;;  %v1993_v36 = vld [vmem:[%s3310_s3 + $0x40] sm:$0xff]  ;;  %1534 = vmatpush.bf16.msra.mxu3 %v2011_v56  ;;  %vm2966_vm4 = vmor %vm479_vm1, %vm480_vm3 }
 0x104   :  { %v2942_v45 = vmin.f32 %v811_v44, 16.0  ;;  %v516_v1 = vsub.f32 1.0, %v515_v4  ;;  %v525_v22 = vand.u32 2147483648, %v2808_v6  ;;  %v589_v18 = vadd.f32 0.112945676, %v588_v63  ;;  %1494 = vmatpush.bf16.msra.mxu0 %v1985_v48  ;;  %1508 = vmatpush.bf16.msra.mxu1 %v1993_v36  ;;  %v2032_v44 = vld [vmem:[%s3310_s3 + $0x178] sm:$0xff] }
 0x105   :  { %v851_v39 = vmul.f32 %v2932_v37, %v2932_v37  ;;  %v2957_v40 = vmul.f32 %v942_v50, %v2611_v60  ;;  %v2959_v23 = vadd.f32 1.0, %v552_v59  ;;  %v787_v42 = vadd.f32 0.014752088, %v786_v19  ;;  %v2009_v4 = vld [vmem:[%s3310_s3 + $0xc0] sm:$0xff] }
 0x106   :  { %v813_v17 = vmul.f32 2.1237322e-06, %v2942_v45  ;;  %vm519_vm5 = vweird.f32 %v2808_v6  ;;  %v575_v63 = vmul.f32 %v574_v15, %v2790_v7  ;;  %v776_v60 = vadd.f32 0.0036580483, %v775_v28  ;;  %v2002_v15 = vld [vmem:[%s3310_s3 + $0x88] sm:$0xff] }
 0x107   :  { %v824_v62 = vmul.f32 3.8918573e-05, %v2942_v45  ;;  %v482_v46 = vsel %vm2966_vm4, %v2814_v54, %v478_v52  ;;  %v539_v47 = vmul.f32 %v538_v33, %v2718_v26  ;;  %v788_v50 = vmul.f32 %v787_v42, %v2847_v14  ;;  %v2010_v28 = vld [vmem:[%s3310_s3 + $0xc8] sm:$0xff]  ;;  %1521 = vmatpush.bf16.msra.mxu2 %v2002_v15  ;;  %1495 = vmatmul.bf16.vlgmr.msra.gmra.mxu0 %v963_v43 }
 0x108   :  { %v814_v59 = vadd.f32 0.00028619796, %v813_v17  ;;  %v517_v19 = vmul.f32 %v2887_v9, %v516_v1  ;;  %v590_v54 = vmul.f32 %v589_v18, %v2790_v7  ;;  %v2992_v52 = vmin.f32 %v851_v39, 16.0  ;;  %1543 = vmatpush.bf16.msrb.mxu0 %v2024_v24  ;;  %1557 = vmatpush.bf16.msrb.mxu1 %v2032_v44  ;;  %v2023_v1 = vld [vmem:[%s3310_s3 + $0x130] sm:$0xff]  ;;  %v2001_v17 = vld [vmem:[%s3310_s3 + $0x80] sm:$0xff]  ;;  %v2040_v24 = vld [vmem:[%s3310_s3 + $0x1b8] sm:$0xff] }
 0x109   :  { %v825_v31 = vadd.f32 0.001143296, %v824_v62  ;;  %v966_v33 = vpack.c.bf16 %v2957_v40, %v2793_v0  ;;  %vm520_vm6 = vweird.f32 %v2887_v9  ;;  %v2997_v56 = vor.u32 1.1754944e-38, %v525_v22  ;;  %v2031_v18 = vld [vmem:[%s3310_s3 + $0x170] sm:$0xff]  ;;  %1535 = vmatpush.bf16.msra.mxu3 %v2010_v28  ;;  %v256_v62 = vpop.f32.mrf.mxu3  ;;  %1509 = vmatmul.bf16.vlgmr.msra.gmra.mxu1 %v964_v11  ;;  %v2030_v28 = vld [vmem:[%s3310_s3 + $0x168] sm:$0xff] }
 0x10a   :  { %2073 = vrcp.f32 %v2959_v23  ;;  %v487_v39 = vsel %vm2924_vm2, %v2910_v41, %v482_v46  ;;  %vm3009_vm7 = vcmp.eq.f32.partialorder %v523_v30, 8.507059e+37  ;;  %v576_v22 = vadd.f32 0.0036580483, %v575_v63  ;;  %v2048_v46 = vld [vmem:[%s3310_s3 + $0x1f8] sm:$0xff]  ;;  %vm3059_vm8 = vmor %vm519_vm5, %vm520_vm6 }
 0x10b   :  { %v789_v36 = vadd.f32 0.112945676, %v788_v50  ;;  %v815_v42 = vmul.f32 %v814_v59, %v2942_v45  ;;  %v540_v41 = vadd.f32 0.18741608, %v539_v47  ;;  %v777_v27 = vmul.f32 %v776_v60, %v2847_v14  ;;  %1522 = vmatpush.bf16.msra.mxu2 %v2001_v17 }
 0x10c   :  { %v826_v30 = vmul.f32 %v825_v31, %v2942_v45  ;;  %v853_v63 = vmul.f32 2.1237322e-06, %v2992_v52  ;;  %v518_v58 = vadd.f32 %v2887_v9, %v517_v19  ;;  %v591_v51 = vadd.f32 0.4994258, %v590_v54  ;;  %1544 = vmatpush.bf16.msrb.mxu0 %v2023_v1  ;;  %1558 = vmatpush.bf16.msrb.mxu1 %v2031_v18  ;;  %v2039_v1 = vld [vmem:[%s3310_s3 + $0x1b0] sm:$0xff] }
 0x10d   :  { %v790_v43 = vmul.f32 %v789_v36, %v2847_v14  ;;  %v816_v60 = vadd.f32 0.0036580483, %v815_v42  ;;  %v488_v47 = vmul.f32 %v487_v39, %v2897_v35  ;;  %v864_v44 = vmul.f32 3.8918573e-05, %v2992_v52  ;;  %1536 = vmatpush.bf16.msra.mxu3 %v2009_v4  ;;  %v2022_v35 = vld [vmem:[%s3310_s3 + $0x128] sm:$0xff]  ;;  %v2047_v18 = vld [vmem:[%s3310_s3 + $0x1f0] sm:$0xff] }
 0x10e   :  { %v827_v50 = vadd.f32 0.014752088, %v826_v30  ;;  %v854_v59 = vadd.f32 0.00028619796, %v853_v63  ;;  %v577_v15 = vmul.f32 %v576_v22, %v2790_v7  ;;  %v3041_v13 = vmul.f32 0.5, %v2784_v32  ;;  %1523 = vmatmul.bf16.vlgmr.msra.gmra.mxu2 %v965_v53  ;;  %v2029_v53 = vld [vmem:[%s3310_s3 + $0x160] sm:$0xff] }
 0x10f   :  { %v791_v55 = vadd.f32 0.4994258, %v790_v43  ;;  %v3045_v11 = vadd.f32 %v256_v62, %v49_v12  ;;  %1571 = vmatpush.bf16.msrb.mxu2 %v2040_v24  ;;  %v541_v12 = vmul.f32 %v540_v41, %v2718_v26  ;;  %v778_v32 = vadd.f32 0.05243302, %v777_v27  ;;  %v2038_v30 = vld [vmem:[%s3310_s3 + $0x1a8] sm:$0xff]  ;;  %v2020_v43 = vld [vmem:[%s3310_s3 + $0x118] sm:$0xff] }
 0x110   :  { %v3053_v19 = vpop.eup %2073  ;;  %v828_v54 = vmul.f32 %v827_v50, %v2942_v45  ;;  %v865_v31 = vadd.f32 0.001143296, %v864_v44  ;;  %v522_v6 = vsel %vm3059_vm8, %v2887_v9, %v518_v58  ;;  %v592_v39 = vmul.f32 %v591_v51, %v2790_v7  ;;  %1545 = vmatpush.bf16.msrb.mxu0 %v2022_v35  ;;  %1559 = vmatpush.bf16.msrb.mxu1 %v2030_v28  ;;  %v2046_v63 = vld [vmem:[%s3310_s3 + $0x1e8] sm:$0xff]  ;;  %v2037_v35 = vld [vmem:[%s3310_s3 + $0x1a0] sm:$0xff] }
 0x111   :  { %1585 = vmatpush.bf16.msrb.mxu3 %v2048_v46  ;;  %v3076_v26 = vmul.f32 0.5, %v2858_v10  ;;  %v817_v22 = vmul.f32 %v816_v60, %v2942_v45  ;;  %v1700_v36 = vclamps-f32 %v488_v47, 1.0  ;;  %v792_v42 = vmul.f32 %v791_v55, %v2847_v14  ;;  %v2028_v60 = vld [vmem:[%s3310_s3 + $0x158] sm:$0xff]  ;;  %v2045_v28 = vld [vmem:[%s3310_s3 + $0x1e0] sm:$0xff] }
 0x112   :  { %v829_v17 = vadd.f32 0.112945676, %v828_v54  ;;  %v855_v4 = vmul.f32 %v854_v59, %v2992_v52  ;;  %1537 = vmatmul.bf16.vlgmr.msra.gmra.mxu3 %v966_v33  ;;  %v555_v10 = vmul.f32 %v3053_v19, %v2959_v23  ;;  %v578_v9 = vadd.f32 0.05243302, %v577_v15 }
 0x113   :  { %v866_v41 = vmul.f32 %v865_v31, %v2992_v52  ;;  %v3091_v21 = vmul.f32 0.70710677, %v3045_v11  ;;  %1572 = vmatpush.bf16.msrb.mxu2 %v2039_v1  ;;  %v527_v0 = vsel %vm3009_vm7, %v2997_v56, %v522_v6  ;;  %v779_v40 = vmul.f32 %v778_v32, %v2847_v14 }
 0x114   :  { %v3103_v33 = vadd.f32 1.0, %v792_v42  ;;  %v830_v27 = vmul.f32 %v829_v17, %v2942_v45  ;;  %v3112_v62 = vadd.f32 1.0, %v592_v39  ;;  %v818_v24 = vadd.f32 0.05243302, %v817_v22  ;;  %1546 = vmatpush.bf16.msrb.mxu0 %v2021_v3  ;;  %1560 = vmatpush.bf16.msrb.mxu1 %v2029_v53  ;;  %v2019_v42 = vld [vmem:[%s3310_s3 + $0x110] sm:$0xff]  ;;  %v2036_v3 = vld [vmem:[%s3310_s3 + $0x198] sm:$0xff] }
 0x115   :  { %1586 = vmatpush.bf16.msrb.mxu3 %v2047_v18  ;;  %v867_v48 = vadd.f32 0.014752088, %v866_v41  ;;  %v891_v56 = vmul.f32 %v3091_v21, %v3091_v21  ;;  %v503_v46 = vmul.f32 %v2913_v61, %v2571_v38  ;;  %v542_v58 = vadd.f32 1.1283791, %v541_v12  ;;  %v2027_v41 = vld [vmem:[%s3310_s3 + $0x150] sm:$0xff] }
 0x116   :  { %2075 = vrcp.f32 %v3103_v33  ;;  %v856_v51 = vadd.f32 0.0036580483, %v855_v4  ;;  %v3125_v47 = vadd.f32 1.0, %v1700_v36  ;;  %v556_v50 = vsub.f32 1.0, %v555_v10 }
 0x117   :  { %v565_v59 = vand.u32 2147483648, %v2959_v23  ;;  %v831_v44 = vadd.f32 0.4994258, %v830_v27  ;;  %1573 = vmatpush.bf16.msrb.mxu2 %v2038_v30  ;;  %v3128_v38 = vmul.f32 %v527_v0, %v503_v46  ;;  %v780_v61 = vadd.f32 0.18741608, %v779_v40  ;;  %v2044_v27 = vld [vmem:[%s3310_s3 + $0x1d8] sm:$0xff] }
 0x118   :  { %v868_v15 = vmul.f32 %v867_v48, %v2992_v52  ;;  %v3131_v55 = vmin.f32 %v891_v56, 16.0  ;;  %v579_v49 = vmul.f32 %v578_v9, %v2790_v7  ;;  %2077 = vrcp.f32 %v3112_v62  ;;  %1547 = vmatpush.bf16.msrb.mxu0 %v2020_v43  ;;  %1561 = vmatpush.bf16.msrb.mxu1 %v2028_v60  ;;  %v2026_v48 = vld [vmem:[%s3310_s3 + $0x148] sm:$0xff] }
 0x119   :  { %1587 = vmatpush.bf16.msrb.mxu3 %v2046_v63  ;;  %v819_v12 = vmul.f32 %v818_v24, %v2942_v45  ;;  %v832_v32 = vmul.f32 %v831_v44, %v2942_v45  ;;  %v857_v54 = vmul.f32 %v856_v51, %v2992_v52  ;;  %v3147_v6 = vmul.f32 %v542_v58, %v2689_v5  ;;  %v2018_v24 = vld [vmem:[%s3310_s3 + $0x108] sm:$0xff]  ;;  %v2035_v44 = vld [vmem:[%s3310_s3 + $0x190] sm:$0xff] }
 0x11a   :  { %v869_v31 = vadd.f32 0.112945676, %v868_v15  ;;  %v893_v1 = vmul.f32 2.1237322e-06, %v3131_v55  ;;  %v904_v18 = vmul.f32 3.8918573e-05, %v3131_v55  ;;  %v557_v39 = vmul.f32 %v3053_v19, %v556_v50 }
 0x11b   :  { %v563_v22 = vand.u32 2147483647, %v2959_v23  ;;  %v3151_v36 = vadd.f32 1.0, %v832_v32  ;;  %1574 = vmatpush.bf16.msrb.mxu2 %v2037_v35  ;;  %v781_v4 = vmul.f32 %v780_v61, %v2847_v14  ;;  %v1701_v53 = vclamps-f32 %v3128_v38, 1.0  ;;  %v2043_v61 = vld [vmem:[%s3310_s3 + $0x1d0] sm:$0xff] }
 0x11c   :  { %v3156_v17 = vpop.eup %2075  ;;  %v870_v10 = vmul.f32 %v869_v31, %v2992_v52  ;;  %v894_v9 = vadd.f32 0.00028619796, %v893_v1  ;;  %v905_v5 = vadd.f32 0.001143296, %v904_v18  ;;  %v3167_v0 = vor.u32 1.1754944e-38, %v565_v59  ;;  %1548 = vmatpush.bf16.msrb.mxu0 %v2019_v42  ;;  %1562 = vmatpush.bf16.msrb.mxu1 %v2027_v41  ;;  %v2017_v1 = vld [vmem:[%s3310_s3 + $0x100] sm:$0xff] }
 0x11d   :  { %1588 = vmatpush.bf16.msrb.mxu3 %v2045_v28  ;;  %v3169_v40 = vadd.f32 0.18741608, %v579_v49  ;;  %v795_v14 = vmul.f32 %v3156_v17, %v3103_v33  ;;  %vm559_vm9 = vweird.f32 %v2959_v23  ;;  %v820_v30 = vadd.f32 0.18741608, %v819_v12  ;;  %v2025_v18 = vld [vmem:[%s3310_s3 + $0x140] sm:$0xff]  ;;  %v2042_v41 = vld [vmem:[%s3310_s3 + $0x1c8] sm:$0xff] }
 0x11e   :  { %2079 = vrcp.f32 %v3151_v36  ;;  %v858_v63 = vadd.f32 0.05243302, %v857_v54  ;;  %v3184_v56 = vpop.eup %2077  ;;  %v3187_v46 = vadd.f32 %v3053_v19, %v557_v39  ;;  %vm560_vm10 = vweird.f32 %v3053_v19 }
 0x11f   :  { %v796_v58 = vsub.f32 1.0, %v795_v14  ;;  %v871_v51 = vadd.f32 0.4994258, %v870_v10  ;;  %1575 = vmatpush.bf16.msrb.mxu2 %v2036_v3  ;;  %v782_v43 = vadd.f32 1.1283791, %v781_v4  ;;  %v805_v60 = vand.u32 2147483648, %v3103_v33  ;;  %vm3221_vm13 = vmor %vm559_vm9, %vm560_vm10 }
 0x120   :  { %v895_v50 = vmul.f32 %v894_v9, %v3131_v55  ;;  %v906_v59 = vmul.f32 %v905_v5, %v3131_v55  ;;  %vm3199_vm11 = vcmp.eq.f32.partialorder %v563_v22, 8.507059e+37  ;;  %vm800_vm12 = vweird.f32 %v3156_v17  ;;  %1549 = vmatpush.bf16.msrb.mxu0 %v2018_v24  ;;  %1563 = vmatpush.bf16.msrb.mxu1 %v2026_v48 }
 0x121   :  { %1589 = vmatpush.bf16.msrb.mxu3 %v2044_v27  ;;  %v797_v35 = vmul.f32 %v3156_v17, %v796_v58  ;;  %v803_v28 = vand.u32 2147483647, %v3103_v33  ;;  %v872_v49 = vmul.f32 %v871_v51, %v2992_v52  ;;  %v595_v12 = vmul.f32 %v3184_v56, %v3112_v62 }
 0x122   :  { %v821_v32 = vmul.f32 %v820_v30, %v2942_v45  ;;  %v859_v54 = vmul.f32 %v858_v63, %v2992_v52  ;;  %v907_v31 = vadd.f32 0.014752088, %v906_v59  ;;  %vm799_vm14 = vweird.f32 %v3103_v33  ;;  %v2034_v33 = vld [vmem:[%s3310_s3 + $0x188] sm:$0xff] }
 0x123   :  { %v798_v45 = vadd.f32 %v3156_v17, %v797_v35  ;;  %v3227_v22 = vadd.f32 1.0, %v872_v49  ;;  %v896_v42 = vadd.f32 0.0036580483, %v895_v50  ;;  %1576 = vmatpush.bf16.msrb.mxu2 %v2035_v44  ;;  %v562_v10 = vsel %vm3221_vm13, %v3053_v19, %v3187_v46  ;;  %vm801_vm15 = vmor %vm799_vm14, %vm800_vm12  ;;  %v2041_v50 = vld [vmem:[%s3310_s3 + $0x1c0] sm:$0xff] }
 0x124   :  { %v2080_v4 = vpop.eup %2079  ;;  %v783_v23 = vmul.f32 %v782_v43, %v2812_v20  ;;  %v806_v9 = vor.u32 1.1754944e-38, %v805_v60  ;;  %v908_v5 = vmul.f32 %v907_v31, %v3131_v55  ;;  %vm804_vm0 = vcmp.eq.f32.partialorder %v803_v28, 8.507059e+37  ;;  %1550 = vmatpush.bf16.msrb.mxu0 %v2017_v1  ;;  %1564 = vmatpush.bf16.msrb.mxu1 %v2025_v18  ;;  %v2033_v60 = vld [vmem:[%s3310_s3 + $0x180] sm:$0xff] }
 0x125   :  { %1590 = vmatpush.bf16.msrb.mxu3 %v2043_v61  ;;  %v802_v3 = vsel %vm801_vm15, %v3156_v17, %v798_v45  ;;  %v835_v20 = vmul.f32 %v2080_v4, %v3151_v36  ;;  %2081 = vrcp.f32 %v3227_v22  ;;  %v596_v19 = vsub.f32 1.0, %v595_v12 }
 0x126   :  { %v807_v14 = vsel %vm804_vm0, %v806_v9, %v802_v3  ;;  %v822_v27 = vadd.f32 1.1283791, %v821_v32  ;;  %v860_v30 = vadd.f32 0.18741608, %v859_v54  ;;  %v897_v48 = vmul.f32 %v896_v42, %v3131_v55 }
 0x127   :  { %v808_v63 = vmul.f32 %v807_v14, %v783_v23  ;;  %v836_v24 = vsub.f32 1.0, %v835_v20  ;;  %v909_v46 = vadd.f32 0.112945676, %v908_v5  ;;  %1577 = vmatpush.bf16.msrb.mxu2 %v2034_v33  ;;  %v951_v17 = vmul.f32 %v3125_v47, %v2831_v25 }
 0x128   :  { %v936_v58 = vadd.f32 1.0, %v1701_v53  ;;  %v843_v51 = vand.u32 2147483647, %v3151_v36  ;;  %v845_v43 = vand.u32 2147483648, %v3151_v36  ;;  %vm840_vm1 = vweird.f32 %v2080_v4 }
 0x129   :  { %1591 = vmatpush.bf16.msrb.mxu3 %v2042_v41  ;;  %v1708_v59 = vclamps-f32 %v808_v63, 1.0  ;;  %v837_v44 = vmul.f32 %v2080_v4, %v836_v24  ;;  %v910_v25 = vmul.f32 %v909_v46, %v3131_v55  ;;  %v567_v47 = vsel %vm3199_vm11, %v3167_v0, %v562_v10 }
 0x12a   :  { %v581_v38 = vmul.f32 %v3169_v40, %v2790_v7  ;;  %v597_v53 = vmul.f32 %v3184_v56, %v596_v19  ;;  %vm839_vm2 = vweird.f32 %v3151_v36  ;;  %vm599_vm3 = vweird.f32 %v3112_v62 }
 0x12b   :  { %v2082_v61 = vpop.eup %2081  ;;  %v943_v35 = vadd.f32 1.0, %v1708_v59  ;;  %v838_v28 = vadd.f32 %v2080_v4, %v837_v44  ;;  %v898_v49 = vadd.f32 0.05243302, %v897_v48  ;;  %v911_v12 = vadd.f32 0.4994258, %v910_v25  ;;  %1578 = vmatpush.bf16.msrb.mxu2 %v2033_v60  ;;  %vm841_vm4 = vmor %vm839_vm2, %vm840_vm1 }
 0x12c   :  { %v823_v32 = vmul.f32 %v822_v27, %v2890_v34  ;;  %v846_v15 = vor.u32 1.1754944e-38, %v845_v43  ;;  %v861_v0 = vmul.f32 %v860_v30, %v2992_v52  ;;  %v875_v7 = vmul.f32 %v2082_v61, %v3227_v22 }
 0x12d   :  { %1592 = vmatpush.bf16.msrb.mxu3 %v2041_v50  ;;  %v959_v40 = vmul.f32 %v943_v35, %v3041_v13  ;;  %v842_v36 = vsel %vm841_vm4, %v2080_v4, %v838_v28  ;;  %vm844_vm5 = vcmp.eq.f32.partialorder %v843_v51, 8.507059e+37  ;;  %v912_v54 = vmul.f32 %v911_v12, %v3131_v55 }
 0x12e   :  { %v568_v31 = vmul.f32 %v567_v47, %v3147_v6  ;;  %v847_v1 = vsel %vm844_vm5, %v846_v15, %v842_v36  ;;  %v876_v18 = vsub.f32 1.0, %v875_v7  ;;  %v885_v39 = vand.u32 2147483648, %v3227_v22 }
 0x12f   :  { %v967_v34 = vpack.c.bf16 %v959_v40, %v951_v17  ;;  %v848_v45 = vmul.f32 %v847_v1, %v823_v32  ;;  %v899_v42 = vmul.f32 %v898_v49, %v3131_v55  ;;  %v913_v52 = vadd.f32 1.0, %v912_v54 }
 0x130   :  { %v862_v10 = vadd.f32 1.1283791, %v861_v0  ;;  %v877_v23 = vmul.f32 %v2082_v61, %v876_v18  ;;  %vm880_vm6 = vweird.f32 %v2082_v61  ;;  %v883_v13 = vand.u32 2147483647, %v3227_v22 }
 0x131   :  { %v598_v4 = vadd.f32 %v3184_v56, %v597_v53  ;;  %vm600_vm7 = vweird.f32 %v3184_v56  ;;  %v1709_v9 = vclamps-f32 %v848_v45, 1.0  ;;  %2083 = vrcp.f32 %v913_v52  ;;  %1551 = vmatmul.bf16.vlgmr.msrb.gmra.mxu0 %v967_v34 }
 0x132   :  { %v603_v6 = vand.u32 2147483647, %v3112_v62  ;;  %v605_v5 = vand.u32 2147483648, %v3112_v62  ;;  %v878_v33 = vadd.f32 %v2082_v61, %v877_v23  ;;  %vm879_vm8 = vweird.f32 %v3227_v22  ;;  %vm3285_vm10 = vmor %vm599_vm3, %vm600_vm7 }
 0x133   :  { %v1702_v41 = vclamps-f32 %v568_v31, 1.0  ;;  %v944_v3 = vadd.f32 1.0, %v1709_v9  ;;  %vm881_vm9 = vmor %vm879_vm8, %vm880_vm6  ;;  %v886_v20 = vor.u32 1.1754944e-38, %v885_v39  ;;  %v900_v19 = vadd.f32 0.18741608, %v899_v42 }
 0x134   :  { %v952_v14 = vmul.f32 %v936_v58, %v2864_v2  ;;  %v863_v30 = vmul.f32 %v862_v10, %v2932_v37  ;;  %v882_v63 = vsel %vm881_vm9, %v2082_v61, %v878_v33  ;;  %vm884_vm11 = vcmp.eq.f32.partialorder %v883_v13, 8.507059e+37 }
 0x135   :  { %v582_v24 = vadd.f32 1.1283791, %v581_v38  ;;  %v602_v22 = vsel %vm3285_vm10, %v3184_v56, %v598_v4  ;;  %v960_v48 = vmul.f32 %v944_v3, %v3076_v26  ;;  %v887_v46 = vsel %vm884_vm11, %v886_v20, %v882_v63 }
 0x136   :  { %v606_v17 = vor.u32 1.1754944e-38, %v605_v5  ;;  %v888_v2 = vmul.f32 %v887_v46, %v863_v30  ;;  %v937_v62 = vadd.f32 1.0, %v1702_v41  ;;  %vm604_vm12 = vcmp.eq.f32.partialorder %v603_v6, 8.507059e+37 }
 0x137   :  { %v2084_v58 = vpop.eup %2083  ;;  %v968_v51 = vpack.c.bf16 %v960_v48, %v952_v14  ;;  %v901_v43 = vmul.f32 %v900_v19, %v3131_v55  ;;  %v265_v59 = vmul.f32 0.5, %v2657_v29  ;;  %v583_v44 = vmul.f32 %v582_v24, %v2768_v57 }
 0x138   :  { %v607_v60 = vsel %vm604_vm12, %v606_v17, %v602_v22  ;;  %v1710_v37 = vclamps-f32 %v888_v2, 1.0  ;;  %v915_v50 = vmul.f32 %v2084_v58, %v913_v52  ;;  %v273_v56 = vmul.f32 0.5, %v2894_v16 }
 0x139   :  { %1565 = vmatmul.bf16.vlgmr.msrb.gmra.mxu1 %v968_v51  ;;  %v953_v47 = vmul.f32 %v937_v62, %v265_v59  ;;  %v608_v38 = vmul.f32 %v607_v60, %v583_v44  ;;  %v902_v53 = vadd.f32 1.1283791, %v901_v43  ;;  %v925_v61 = vand.u32 2147483648, %v913_v52 }
 0x13a   :  { %v945_v26 = vadd.f32 1.0, %v1710_v37  ;;  %v916_v25 = vsub.f32 1.0, %v915_v50  ;;  %vm920_vm13 = vweird.f32 %v2084_v58  ;;  %v923_v55 = vand.u32 2147483647, %v913_v52 }
 0x13b   :  { %vm919_vm14 = vweird.f32 %v913_v52  ;;  %v926_v29 = vor.u32 1.1754944e-38, %v925_v61  ;;  %v1703_v32 = vclamps-f32 %v608_v38, 1.0  ;;  %v903_v57 = vmul.f32 %v902_v53, %v3091_v21  ;;  %v2052_v21 = vld [vmem:[%s3311_s4] ss:$0 sm:$0xff]  ;;  %s2111_s4 = smov [#allocation2]  }
 0x13c   :  { %v961_v35 = vmul.f32 %v945_v26, %v273_v56  ;;  %v917_v28 = vmul.f32 %v2084_v58, %v916_v25  ;;  %vm921_vm15 = vmor %vm919_vm14, %vm920_vm13  ;;  %vm924_vm0 = vcmp.eq.f32.partialorder %v923_v55, 8.507059e+37  ;;  %v266_v36 = vmul.f32 0.5, %v2755_v8  ;;  %s1606_s24 = sshll.u32 %s2111_s4, 4  ;;  %s1607_s24 = int_to_ptr.vmem [resolvable:$true] %s1606_s24 }
 0x13d   :  { %v938_v7 = vadd.f32 1.0, %v1703_v32  ;;  %v274_v54 = vmul.f32 0.5, %v3045_v11  ;;  %vm1599_vm1 = vcmask 523264  }
 0x13e   :  { %v969_v49 = vpack.c.bf16 %v961_v35, %v953_v47  ;;  %v918_v12 = vadd.f32 %v2084_v58, %v917_v28 }
 0x13f   :  { %v954_v1 = vmul.f32 %v938_v7, %v266_v36 }
 0x140   :  { %v922_v15 = vsel %vm921_vm15, %v2084_v58, %v918_v12  ;;  %1579 = vmatmul.bf16.vlgmr.msrb.gmra.mxu2 %v969_v49 }
 0x141   :  { %v927_v16 = vsel %vm924_vm0, %v926_v29, %v922_v15 }
 0x142   :  { %v928_v0 = vmul.f32 %v927_v16, %v903_v57 }
 0x144   :  { %v1711_v40 = vclamps-f32 %v928_v0, 1.0 }
 0x146   :  { %v946_v31 = vadd.f32 1.0, %v1711_v40 }
 0x148   :  { %v962_v18 = vmul.f32 %v946_v31, %v274_v54 }
 0x14a   :  { %v970_v39 = vpack.c.bf16 %v962_v18, %v954_v1 }
 0x14c   :  { %1593 = vmatmul.bf16.vlgmr.msrb.gmra.mxu3 %v970_v39 }
 0x184   :  { %v1496_v34 = vpop.f32.mrf.mxu0 }
 0x185   :  { %v1497_v10 = vadd.f32 %v2052_v21, %v1496_v34 }
 0x186   :  { %v1510_v45 = vpop.f32.mrf.mxu1 }
 0x187   :  { %v1511_v13 = vadd.f32 %v1510_v45, %v1497_v10 }
 0x18c   :  { %v1498_v52 = vpop.f32.mrf.mxu0 }
 0x18d   :  { %v1499_v11 = vadd.f32 %v2052_v21, %v1498_v52 }
 0x18e   :  { %v1512_v4 = vpop.f32.mrf.mxu1 }
 0x18f   :  { %v1513_v33 = vadd.f32 %v1512_v4, %v1499_v11 }
 0x191   :  { %v1524_v42 = vpop.f32.mrf.mxu2 }
 0x192   :  { %v1525_v9 = vadd.f32 %v1524_v42, %v1511_v13 }
 0x195   :  { %v1538_v23 = vpop.f32.mrf.mxu3 }
 0x196   :  { %v1539_v5 = vadd.f32 %v1538_v23, %v1525_v9 }
 0x199   :  { %v1526_v8 = vpop.f32.mrf.mxu2 }
 0x19a   :  { %v1527_v20 = vadd.f32 %v1526_v8, %v1513_v33 }
 0x19d   :  { %v1540_v41 = vpop.f32.mrf.mxu3 }
 0x19e   :  { %v1541_v30 = vadd.f32 %v1540_v41, %v1527_v20 }
 0x1ae   :  { %v1552_v6 = vpop.f32.mrf.mxu0 }
 0x1af   :  { %v1553_v3 = vadd.f32 %v1552_v6, %v1539_v5 }
 0x1b6   :  { %v1566_v19 = vpop.f32.mrf.mxu1  ;;  %v1554_v63 = vpop.f32.mrf.mxu0 }
 0x1b7   :  { %v1567_v27 = vadd.f32 %v1566_v19, %v1553_v3  ;;  %v1555_v22 = vadd.f32 %v1554_v63, %v1541_v30 }
 0x1be   :  { %v1568_v17 = vpop.f32.mrf.mxu1 }
 0x1bf   :  { %v1569_v58 = vadd.f32 %v1568_v17, %v1555_v22 }
 0x1c3   :  { %v1580_v14 = vpop.f32.mrf.mxu2 }
 0x1c4   :  { %v1581_v24 = vadd.f32 %v1580_v14, %v1567_v27 }
 0x1cb   :  { %v1582_v2 = vpop.f32.mrf.mxu2 }
 0x1cc   :  { %v1583_v62 = vadd.f32 %v1582_v2, %v1569_v58 }
 0x1cf   :  { %v1594_v48 = vpop.f32.mrf.mxu3 }
 0x1d0   :  { %v1595_v46 = vadd.f32 %v1594_v48, %v1581_v24 }
 0x1d2   :  { %1600 = vst.msk [vmem:[#allocation2] sm:$0xff] %vm1599_vm1, %v1595_v46 }
 0x1d7   :  { %v1596_v51 = vpop.f32.mrf.mxu3 }
 0x1d8   :  { %v1597_v43 = vadd.f32 %v1596_v51, %v1583_v62 }
 0x1da   :  { %1601 = vst.msk [vmem:[#allocation2 + $0x8] sm:$0xff] %vm1599_vm1, %v1597_v43 }
 0x1db   :  { %1614 = dma.vmem_to_hbm [thread:$0]  %s1607_s24, 256, %s1609_s27, [#allocation3], %s2112_s28, %s2112_s28, %s2113_s29  }
 0x1dc   :  { %2109 = dma.done.wait [#allocation3], 256  }
 0x1dd   :  { %2110 = vsyncadd [#allocation3], 4294967040 }
 0x1de   :  { %1619 = vsyncpa [#allocation3], 1 }

</bundles_post_ra>
